<compile_context>
chip_gen: v7x
topology: tpu7x:2x2x1
jax: 0.10.0
libtpu: 0.0.40
codegen_flags: <defaults>
</compile_context>

<pallas_src>
import math

import numpy as np
import jax
import jax.numpy as jnp
from jax.experimental import pallas as pl
from jax.experimental.pallas import tpu as pltpu

LATENT_DIM = 64
VISUAL_LEN = 128
HIDDEN = 64
IN_DIM = VISUAL_LEN + LATENT_DIM           # 192
OUT_DIMS = (4, 3, 3)                       # rotation, point, force
OUT_COL_OFF = (0, 4, 7)                    # column offsets in the fused output
FUSED = 3 * HIDDEN                         # 192 (== IN_DIM, convenient)
N_SLAB_LAYERS = 8                          # 3 trunk + fc_1 + 2*2 block linears
OUT_PAD = 128                              # lane-dense output width (final layer)
ROT_DIM = OUT_DIMS[0]

N_TRUNK_PARAMS = 6
N_DEC_PARAMS = 12
N_PARAMS = N_TRUNK_PARAMS + 3 * N_DEC_PARAMS   # 42 original weight/bias tensors


def _relu(x):
    return jnp.maximum(x, 0.0)


def _leaky(x):
    return jnp.where(x > 0, x, 0.2 * x)


def _round_up(n, m):
    return ((n + m - 1) // m) * m


# ----------------------------- Pallas kernel --------------------------------
def _test_decoder_kernel(x_ref, w_ref, b_ref, wl_ref, bl_ref, out_ref):
    """x_ref: [bm, 192] f32; w_ref: [8, 192, 192] bf16; b_ref: [8, 1, 192] f32;
    wl_ref: [192, 128] bf16; bl_ref: [1, 128] f32; out_ref: [bm, 128] f32."""

    def lin(h, layer):
        # bf16 operands (native MXU path), f32 accumulation, f32 bias add.
        return (
            jnp.dot(h.astype(jnp.bfloat16), w_ref[layer],
                    preferred_element_type=jnp.float32)
            + b_ref[layer]
        )

    # trunk: fc_1 / fc_2 / fc_3 with ReLU (live in cols 0:64; pad cols stay 0)
    h = x_ref[...]
    for layer in range(3):
        h = _relu(lin(h, layer))

    # fused LocalDecoders: leaky_relu(fc_1) -> 2 x ResnetBlockFC (block-diag)
    y = _leaky(lin(h, 3))
    for blk in range(2):
        net = lin(_relu(y), 4 + 2 * blk)     # fc_0(relu(y))
        dx = lin(_relu(net), 5 + 2 * blk)    # fc_1(relu(net))
        y = y + dx                           # residual (no shortcut linear)

    # final fused fc: 192 -> 128 (cols 0:10 meaningful), written directly.
    out = (
        jnp.dot(y.astype(jnp.bfloat16), wl_ref[...],
                preferred_element_type=jnp.float32)
        + bl_ref[...]
    )

    # F.normalize(rotation, dim=1): rotation lives in lanes 0:4 of one lane tile.
    lane = jax.lax.broadcasted_iota(jnp.int32, out.shape, 1)
    rot_mask = lane < ROT_DIM
    sumsq = jnp.sum(jnp.where(rot_mask, out * out, 0.0), axis=-1, keepdims=True)
    scale = jax.lax.rsqrt(jnp.maximum(sumsq, 1e-24))   # == 1 / max(||rot||, 1e-12)
    out_ref[...] = jnp.where(rot_mask, out * scale, out)


def _choose_bm(batch, block_m):
    """Pick the batch tile: minimize padding, >=2 grid steps when B allows (v7x)."""
    b8 = _round_up(batch, 8)
    n_steps = max(1, pl.cdiv(b8, block_m))
    if b8 >= 16:
        n_steps = max(n_steps, 2)   # use both TensorCores on v7x
    return _round_up(pl.cdiv(b8, n_steps), 8)


def test_decoder_pallas(x, w_slab, b_slab, w_last, b_last, *, block_m=2048):
    """x: [B, 192] f32; w_slab: [8,192,192] bf16; b_slab: [8,1,192] f32;
    w_last: [192,128] bf16; b_last: [1,128] f32 -> (rotation, point, force)."""
    B = x.shape[0]
    bm = _choose_bm(B, block_m)
    B_pad = _round_up(B, bm)
    if B_pad != B:
        x = jnp.pad(x, ((0, B_pad - B), (0, 0)))

    flops = 2 * B_pad * (N_SLAB_LAYERS * FUSED * FUSED + FUSED * OUT_PAD)
    bytes_accessed = (
        B_pad * IN_DIM * 4            # x
        + w_slab.size * 2 + b_slab.size * 4
        + w_last.size * 2 + b_last.size * 4
        + B_pad * OUT_PAD * 4         # output
    )
    cost = pl.CostEstimate(flops=int(flops), transcendentals=0,
                           bytes_accessed=int(bytes_accessed))

    out = pl.pallas_call(
        _test_decoder_kernel,
        out_shape=jax.ShapeDtypeStruct((B_pad, OUT_PAD), jnp.float32),
        grid=(B_pad // bm,),
        in_specs=[
            pl.BlockSpec((bm, IN_DIM), lambda i: (i, 0)),
            # constant index maps -> weights/biases stay VMEM-resident across steps
            pl.BlockSpec((N_SLAB_LAYERS, FUSED, FUSED), lambda i: (0, 0, 0)),
            pl.BlockSpec((N_SLAB_LAYERS, 1, FUSED), lambda i: (0, 0, 0)),
            pl.BlockSpec((FUSED, OUT_PAD), lambda i: (0, 0)),
            pl.BlockSpec((1, OUT_PAD), lambda i: (0, 0)),
        ],
        out_specs=pl.BlockSpec((bm, OUT_PAD), lambda i: (i, 0)),
        compiler_params=pltpu.CompilerParams(
            dimension_semantics=("parallel",),
            vmem_limit_bytes=32 * 1024 * 1024,
        ),
        cost_estimate=cost,
    )(x, w_slab, b_slab, w_last, b_last)

    rot = out[:B, 0:4]
    point = out[:B, 4:7]
    force = out[:B, 7:10]
    return rot, point, force


# -------------------------- parameter construction --------------------------
def _init_linear(key, fan_in, fan_out):
    kw, kb = jax.random.split(key)
    bound = 1.0 / math.sqrt(fan_in)
    w = jax.random.uniform(kw, (fan_in, fan_out), jnp.float32, -bound, bound)
    b = jax.random.uniform(kb, (1, fan_out), jnp.float32, -bound, bound)
    return w, b


def make_params(key):
    """Flat list of 42 (W [in,out], b [1,out]) tensors, PyTorch module order."""
    params = []
    keys = iter(jax.random.split(key, 32))

    params += list(_init_linear(next(keys), IN_DIM, HIDDEN))      # trunk fc_1
    params += list(_init_linear(next(keys), HIDDEN, HIDDEN))      # trunk fc_2
    params += list(_init_linear(next(keys), HIDDEN, HIDDEN))      # trunk fc_3

    for out_dim in OUT_DIMS:                                      # 3 LocalDecoders
        params += list(_init_linear(next(keys), HIDDEN, HIDDEN))  # fc_1
        for _ in range(2):                                        # 2 ResnetBlockFC
            params += list(_init_linear(next(keys), HIDDEN, HIDDEN))  # fc_0
            params += list(_init_linear(next(keys), HIDDEN, HIDDEN))  # fc_1
        params += list(_init_linear(next(keys), HIDDEN, out_dim))     # final fc
    assert len(params) == N_PARAMS
    return params


def pack_params(params):
    """Pack 42 tensors into fused slabs.

    Returns (w_slab [8,192,192] bf16, b_slab [8,1,192] f32,
             w_last [192,128] bf16, b_last [1,128] f32)."""
    W = np.zeros((N_SLAB_LAYERS, FUSED, FUSED), np.float32)
    Bv = np.zeros((N_SLAB_LAYERS, 1, FUSED), np.float32)
    Wl = np.zeros((FUSED, OUT_PAD), np.float32)
    Bl = np.zeros((1, OUT_PAD), np.float32)

    # trunk -> layers 0..2, columns 0:64
    for l in range(3):
        w = np.asarray(params[2 * l])
        b = np.asarray(params[2 * l + 1]).reshape(-1)
        W[l, : w.shape[0], :HIDDEN] = w
        Bv[l, 0, :HIDDEN] = b

    # three LocalDecoders -> layers 3..7 + final layer
    for d, out_dim in enumerate(OUT_DIMS):
        base = N_TRUNK_PARAMS + N_DEC_PARAMS * d
        r0 = HIDDEN * d
        # fc_1: reads trunk h (cols 0:64), writes decoder-d columns r0:r0+64
        W[3, :HIDDEN, r0:r0 + HIDDEN] = np.asarray(params[base])
        Bv[3, 0, r0:r0 + HIDDEN] = np.asarray(params[base + 1]).reshape(-1)
        # 2 ResnetBlockFC: block-diagonal 64x64 blocks
        for blk in range(2):
            for sub in range(2):                      # fc_0 then fc_1
                layer = 4 + 2 * blk + sub
                pi = base + 2 + 4 * blk + 2 * sub
                W[layer, r0:r0 + HIDDEN, r0:r0 + HIDDEN] = np.asarray(params[pi])
                Bv[layer, 0, r0:r0 + HIDDEN] = np.asarray(params[pi + 1]).reshape(-1)
        # final fc: decoder-d hidden -> output columns OUT_COL_OFF[d]:+out_dim
        c0 = OUT_COL_OFF[d]
        Wl[r0:r0 + HIDDEN, c0:c0 + out_dim] = np.asarray(params[base + 10])
        Bl[0, c0:c0 + out_dim] = np.asarray(params[base + 11]).reshape(-1)

    return (jnp.asarray(W, dtype=jnp.bfloat16), jnp.asarray(Bv),
            jnp.asarray(Wl, dtype=jnp.bfloat16), jnp.asarray(Bl))


# ------------------------------- reference ----------------------------------
def ref_forward(x, params):
    """Pure-f32 JAX reference, mirrors the PyTorch module exactly."""
    def lin(h, i):
        return h @ params[i] + params[i + 1]

    h = x
    h = _relu(lin(h, 0))
    h = _relu(lin(h, 2))
    h = _relu(lin(h, 4))

    def local(h, base):
        y = _leaky(lin(h, base))
        for blk in range(2):
            o = base + 2 + 4 * blk
            net = lin(_relu(y), o)
            dx = lin(_relu(net), o + 2)
            y = y + dx
        return lin(y, base + 10)

    rot = local(h, N_TRUNK_PARAMS)
    rot = rot / jnp.maximum(
        jnp.sqrt(jnp.sum(rot * rot, axis=-1, keepdims=True)), 1e-12
    )
    pt = local(h, N_TRUNK_PARAMS + N_DEC_PARAMS)
    frc = local(h, N_TRUNK_PARAMS + 2 * N_DEC_PARAMS)
    return rot, pt, frc


# ---------------------------------- main -------------------------------------
if __name__ == "__main__":
    key = jax.random.PRNGKey(0)
    k_x, k_p = jax.random.split(key)

    B = 8
    x = jax.random.normal(k_x, (B, IN_DIM), jnp.float32)
    params = make_params(k_p)
    w_slab, b_slab, w_last, b_last = pack_params(params)

    rot, point, force = test_decoder_pallas(x, w_slab, b_slab, w_last, b_last)
    jax.block_until_ready((rot, point, force))

    rot_r, point_r, force_r = ref_forward(x, params)
    assert rot.shape == (B, 4) and point.shape == (B, 3) and force.shape == (B, 3)
    # bf16 matmul operands vs pure-f32 reference -> relaxed tolerance.
    assert jnp.allclose(rot, rot_r, atol=5e-2, rtol=5e-2)
    assert jnp.allclose(point, point_r, atol=5e-2, rtol=5e-2)
    assert jnp.allclose(force, force_r, atol=5e-2, rtol=5e-2)

    print("KERNEL_OK")
</pallas_src>

<mosaic_0001>
module attributes {stable_mosaic.version = 11 : i64} {
  func.func @_test_decoder_kernel(%arg0: i32, %arg1: memref<8x192xf32, #tpu.memory_space<vmem>>, %arg2: memref<8x192x192xbf16, #tpu.memory_space<vmem>>, %arg3: memref<8x1x192xf32, #tpu.memory_space<vmem>>, %arg4: memref<192x128xbf16, #tpu.memory_space<vmem>>, %arg5: memref<1x128xf32, #tpu.memory_space<vmem>>, %arg6: memref<8x128xf32, #tpu.memory_space<vmem>>) attributes {dimension_semantics = [#tpu.dimension_semantics<parallel>], iteration_bounds = array<i64: 1>, scalar_prefetch = 0 : i64, scratch_operands = 0 : i64, tpu.core_type = #tpu.core_type<tc>, window_params = [{transform_indices = @transform_0, window_bounds = array<i64: 8, 192>}, {pipeline_mode = #tpu.pipeline_mode<synchronous>, transform_indices = @transform_1, window_bounds = array<i64: 8, 192, 192>}, {pipeline_mode = #tpu.pipeline_mode<synchronous>, transform_indices = @transform_2, window_bounds = array<i64: 8, 1, 192>}, {pipeline_mode = #tpu.pipeline_mode<synchronous>, transform_indices = @transform_3, window_bounds = array<i64: 192, 128>}, {pipeline_mode = #tpu.pipeline_mode<synchronous>, transform_indices = @transform_4, window_bounds = array<i64: 1, 128>}, {transform_indices = @transform_5, window_bounds = array<i64: 8, 128>}]} {
    %c0 = arith.constant 0 : index
    %c0_0 = arith.constant 0 : index
    %0 = vector.load %arg1[%c0, %c0_0] : memref<8x192xf32, #tpu.memory_space<vmem>>, vector<8x192xf32>
    %1 = arith.truncf %0 : vector<8x192xf32> to vector<8x192xbf16>
    %c0_1 = arith.constant 0 : index
    %c0_2 = arith.constant 0 : index
    %c0_3 = arith.constant 0 : index
    %2 = vector.load %arg2[%c0_1, %c0_2, %c0_3] : memref<8x192x192xbf16, #tpu.memory_space<vmem>>, vector<1x192x192xbf16>
    %3 = vector.shape_cast %2 : vector<1x192x192xbf16> to vector<192x192xbf16>
    %cst = arith.constant dense<0.000000e+00> : vector<8x192xf32>
    %4 = tpu.matmul %1, %3, %cst {dimension_numbers = #tpu.dot_dimension_numbers<[1], [0], [0], [1], [0, 0, 1, 1], [], []>} : vector<8x192xbf16>, vector<192x192xbf16>, vector<8x192xf32> -> vector<8x192xf32>
    %c0_4 = arith.constant 0 : index
    %c0_5 = arith.constant 0 : index
    %c0_6 = arith.constant 0 : index
    %5 = vector.load %arg3[%c0_4, %c0_5, %c0_6] : memref<8x1x192xf32, #tpu.memory_space<vmem>>, vector<1x1x192xf32>
    %6 = vector.shape_cast %5 : vector<1x1x192xf32> to vector<1x192xf32>
    %7 = vector.broadcast %6 : vector<1x192xf32> to vector<8x192xf32>
    %8 = arith.addf %4, %7 : vector<8x192xf32>
    %cst_7 = arith.constant 0.000000e+00 : f32
    %9 = vector.broadcast %cst_7 : f32 to vector<8x192xf32>
    %10 = arith.maximumf %8, %9 : vector<8x192xf32>
    %11 = arith.truncf %10 : vector<8x192xf32> to vector<8x192xbf16>
    %c1 = arith.constant 1 : index
    %c0_8 = arith.constant 0 : index
    %c0_9 = arith.constant 0 : index
    %12 = vector.load %arg2[%c1, %c0_8, %c0_9] : memref<8x192x192xbf16, #tpu.memory_space<vmem>>, vector<1x192x192xbf16>
    %13 = vector.shape_cast %12 : vector<1x192x192xbf16> to vector<192x192xbf16>
    %cst_10 = arith.constant dense<0.000000e+00> : vector<8x192xf32>
    %14 = tpu.matmul %11, %13, %cst_10 {dimension_numbers = #tpu.dot_dimension_numbers<[1], [0], [0], [1], [0, 0, 1, 1], [], []>} : vector<8x192xbf16>, vector<192x192xbf16>, vector<8x192xf32> -> vector<8x192xf32>
    %c1_11 = arith.constant 1 : index
    %c0_12 = arith.constant 0 : index
    %c0_13 = arith.constant 0 : index
    %15 = vector.load %arg3[%c1_11, %c0_12, %c0_13] : memref<8x1x192xf32, #tpu.memory_space<vmem>>, vector<1x1x192xf32>
    %16 = vector.shape_cast %15 : vector<1x1x192xf32> to vector<1x192xf32>
    %17 = vector.broadcast %16 : vector<1x192xf32> to vector<8x192xf32>
    %18 = arith.addf %14, %17 : vector<8x192xf32>
    %cst_14 = arith.constant 0.000000e+00 : f32
    %19 = vector.broadcast %cst_14 : f32 to vector<8x192xf32>
    %20 = arith.maximumf %18, %19 : vector<8x192xf32>
    %21 = arith.truncf %20 : vector<8x192xf32> to vector<8x192xbf16>
    %c2 = arith.constant 2 : index
    %c0_15 = arith.constant 0 : index
    %c0_16 = arith.constant 0 : index
    %22 = vector.load %arg2[%c2, %c0_15, %c0_16] : memref<8x192x192xbf16, #tpu.memory_space<vmem>>, vector<1x192x192xbf16>
    %23 = vector.shape_cast %22 : vector<1x192x192xbf16> to vector<192x192xbf16>
    %cst_17 = arith.constant dense<0.000000e+00> : vector<8x192xf32>
    %24 = tpu.matmul %21, %23, %cst_17 {dimension_numbers = #tpu.dot_dimension_numbers<[1], [0], [0], [1], [0, 0, 1, 1], [], []>} : vector<8x192xbf16>, vector<192x192xbf16>, vector<8x192xf32> -> vector<8x192xf32>
    %c2_18 = arith.constant 2 : index
    %c0_19 = arith.constant 0 : index
    %c0_20 = arith.constant 0 : index
    %25 = vector.load %arg3[%c2_18, %c0_19, %c0_20] : memref<8x1x192xf32, #tpu.memory_space<vmem>>, vector<1x1x192xf32>
    %26 = vector.shape_cast %25 : vector<1x1x192xf32> to vector<1x192xf32>
    %27 = vector.broadcast %26 : vector<1x192xf32> to vector<8x192xf32>
    %28 = arith.addf %24, %27 : vector<8x192xf32>
    %cst_21 = arith.constant 0.000000e+00 : f32
    %29 = vector.broadcast %cst_21 : f32 to vector<8x192xf32>
    %30 = arith.maximumf %28, %29 : vector<8x192xf32>
    %31 = arith.truncf %30 : vector<8x192xf32> to vector<8x192xbf16>
    %c3 = arith.constant 3 : index
    %c0_22 = arith.constant 0 : index
    %c0_23 = arith.constant 0 : index
    %32 = vector.load %arg2[%c3, %c0_22, %c0_23] : memref<8x192x192xbf16, #tpu.memory_space<vmem>>, vector<1x192x192xbf16>
    %33 = vector.shape_cast %32 : vector<1x192x192xbf16> to vector<192x192xbf16>
    %cst_24 = arith.constant dense<0.000000e+00> : vector<8x192xf32>
    %34 = tpu.matmul %31, %33, %cst_24 {dimension_numbers = #tpu.dot_dimension_numbers<[1], [0], [0], [1], [0, 0, 1, 1], [], []>} : vector<8x192xbf16>, vector<192x192xbf16>, vector<8x192xf32> -> vector<8x192xf32>
    %c3_25 = arith.constant 3 : index
    %c0_26 = arith.constant 0 : index
    %c0_27 = arith.constant 0 : index
    %35 = vector.load %arg3[%c3_25, %c0_26, %c0_27] : memref<8x1x192xf32, #tpu.memory_space<vmem>>, vector<1x1x192xf32>
    %36 = vector.shape_cast %35 : vector<1x1x192xf32> to vector<1x192xf32>
    %37 = vector.broadcast %36 : vector<1x192xf32> to vector<8x192xf32>
    %38 = arith.addf %34, %37 : vector<8x192xf32>
    %cst_28 = arith.constant 0.000000e+00 : f32
    %39 = vector.broadcast %cst_28 : f32 to vector<8x192xf32>
    %40 = arith.cmpf ogt, %38, %39 : vector<8x192xf32>
    %cst_29 = arith.constant 2.000000e-01 : f32
    %41 = vector.broadcast %cst_29 : f32 to vector<8x192xf32>
    %42 = arith.mulf %41, %38 : vector<8x192xf32>
    %43 = arith.select %40, %38, %42 : vector<8x192xi1>, vector<8x192xf32>
    %cst_30 = arith.constant 0.000000e+00 : f32
    %44 = vector.broadcast %cst_30 : f32 to vector<8x192xf32>
    %45 = arith.maximumf %43, %44 : vector<8x192xf32>
    %46 = arith.truncf %45 : vector<8x192xf32> to vector<8x192xbf16>
    %c4 = arith.constant 4 : index
    %c0_31 = arith.constant 0 : index
    %c0_32 = arith.constant 0 : index
    %47 = vector.load %arg2[%c4, %c0_31, %c0_32] : memref<8x192x192xbf16, #tpu.memory_space<vmem>>, vector<1x192x192xbf16>
    %48 = vector.shape_cast %47 : vector<1x192x192xbf16> to vector<192x192xbf16>
    %cst_33 = arith.constant dense<0.000000e+00> : vector<8x192xf32>
    %49 = tpu.matmul %46, %48, %cst_33 {dimension_numbers = #tpu.dot_dimension_numbers<[1], [0], [0], [1], [0, 0, 1, 1], [], []>} : vector<8x192xbf16>, vector<192x192xbf16>, vector<8x192xf32> -> vector<8x192xf32>
    %c4_34 = arith.constant 4 : index
    %c0_35 = arith.constant 0 : index
    %c0_36 = arith.constant 0 : index
    %50 = vector.load %arg3[%c4_34, %c0_35, %c0_36] : memref<8x1x192xf32, #tpu.memory_space<vmem>>, vector<1x1x192xf32>
    %51 = vector.shape_cast %50 : vector<1x1x192xf32> to vector<1x192xf32>
    %52 = vector.broadcast %51 : vector<1x192xf32> to vector<8x192xf32>
    %53 = arith.addf %49, %52 : vector<8x192xf32>
    %cst_37 = arith.constant 0.000000e+00 : f32
    %54 = vector.broadcast %cst_37 : f32 to vector<8x192xf32>
    %55 = arith.maximumf %53, %54 : vector<8x192xf32>
    %56 = arith.truncf %55 : vector<8x192xf32> to vector<8x192xbf16>
    %c5 = arith.constant 5 : index
    %c0_38 = arith.constant 0 : index
    %c0_39 = arith.constant 0 : index
    %57 = vector.load %arg2[%c5, %c0_38, %c0_39] : memref<8x192x192xbf16, #tpu.memory_space<vmem>>, vector<1x192x192xbf16>
    %58 = vector.shape_cast %57 : vector<1x192x192xbf16> to vector<192x192xbf16>
    %cst_40 = arith.constant dense<0.000000e+00> : vector<8x192xf32>
    %59 = tpu.matmul %56, %58, %cst_40 {dimension_numbers = #tpu.dot_dimension_numbers<[1], [0], [0], [1], [0, 0, 1, 1], [], []>} : vector<8x192xbf16>, vector<192x192xbf16>, vector<8x192xf32> -> vector<8x192xf32>
    %c5_41 = arith.constant 5 : index
    %c0_42 = arith.constant 0 : index
    %c0_43 = arith.constant 0 : index
    %60 = vector.load %arg3[%c5_41, %c0_42, %c0_43] : memref<8x1x192xf32, #tpu.memory_space<vmem>>, vector<1x1x192xf32>
    %61 = vector.shape_cast %60 : vector<1x1x192xf32> to vector<1x192xf32>
    %62 = vector.broadcast %61 : vector<1x192xf32> to vector<8x192xf32>
    %63 = arith.addf %59, %62 : vector<8x192xf32>
    %64 = arith.addf %43, %63 : vector<8x192xf32>
    %cst_44 = arith.constant 0.000000e+00 : f32
    %65 = vector.broadcast %cst_44 : f32 to vector<8x192xf32>
    %66 = arith.maximumf %64, %65 : vector<8x192xf32>
    %67 = arith.truncf %66 : vector<8x192xf32> to vector<8x192xbf16>
    %c6 = arith.constant 6 : index
    %c0_45 = arith.constant 0 : index
    %c0_46 = arith.constant 0 : index
    %68 = vector.load %arg2[%c6, %c0_45, %c0_46] : memref<8x192x192xbf16, #tpu.memory_space<vmem>>, vector<1x192x192xbf16>
    %69 = vector.shape_cast %68 : vector<1x192x192xbf16> to vector<192x192xbf16>
    %cst_47 = arith.constant dense<0.000000e+00> : vector<8x192xf32>
    %70 = tpu.matmul %67, %69, %cst_47 {dimension_numbers = #tpu.dot_dimension_numbers<[1], [0], [0], [1], [0, 0, 1, 1], [], []>} : vector<8x192xbf16>, vector<192x192xbf16>, vector<8x192xf32> -> vector<8x192xf32>
    %c6_48 = arith.constant 6 : index
    %c0_49 = arith.constant 0 : index
    %c0_50 = arith.constant 0 : index
    %71 = vector.load %arg3[%c6_48, %c0_49, %c0_50] : memref<8x1x192xf32, #tpu.memory_space<vmem>>, vector<1x1x192xf32>
    %72 = vector.shape_cast %71 : vector<1x1x192xf32> to vector<1x192xf32>
    %73 = vector.broadcast %72 : vector<1x192xf32> to vector<8x192xf32>
    %74 = arith.addf %70, %73 : vector<8x192xf32>
    %cst_51 = arith.constant 0.000000e+00 : f32
    %75 = vector.broadcast %cst_51 : f32 to vector<8x192xf32>
    %76 = arith.maximumf %74, %75 : vector<8x192xf32>
    %77 = arith.truncf %76 : vector<8x192xf32> to vector<8x192xbf16>
    %c7 = arith.constant 7 : index
    %c0_52 = arith.constant 0 : index
    %c0_53 = arith.constant 0 : index
    %78 = vector.load %arg2[%c7, %c0_52, %c0_53] : memref<8x192x192xbf16, #tpu.memory_space<vmem>>, vector<1x192x192xbf16>
    %79 = vector.shape_cast %78 : vector<1x192x192xbf16> to vector<192x192xbf16>
    %cst_54 = arith.constant dense<0.000000e+00> : vector<8x192xf32>
    %80 = tpu.matmul %77, %79, %cst_54 {dimension_numbers = #tpu.dot_dimension_numbers<[1], [0], [0], [1], [0, 0, 1, 1], [], []>} : vector<8x192xbf16>, vector<192x192xbf16>, vector<8x192xf32> -> vector<8x192xf32>
    %c7_55 = arith.constant 7 : index
    %c0_56 = arith.constant 0 : index
    %c0_57 = arith.constant 0 : index
    %81 = vector.load %arg3[%c7_55, %c0_56, %c0_57] : memref<8x1x192xf32, #tpu.memory_space<vmem>>, vector<1x1x192xf32>
    %82 = vector.shape_cast %81 : vector<1x1x192xf32> to vector<1x192xf32>
    %83 = vector.broadcast %82 : vector<1x192xf32> to vector<8x192xf32>
    %84 = arith.addf %80, %83 : vector<8x192xf32>
    %85 = arith.addf %64, %84 : vector<8x192xf32>
    %86 = arith.truncf %85 : vector<8x192xf32> to vector<8x192xbf16>
    %c0_58 = arith.constant 0 : index
    %c0_59 = arith.constant 0 : index
    %87 = vector.load %arg4[%c0_58, %c0_59] : memref<192x128xbf16, #tpu.memory_space<vmem>>, vector<192x128xbf16>
    %cst_60 = arith.constant dense<0.000000e+00> : vector<8x128xf32>
    %88 = tpu.matmul %86, %87, %cst_60 {dimension_numbers = #tpu.dot_dimension_numbers<[1], [0], [0], [1], [0, 0, 1, 1], [], []>} : vector<8x192xbf16>, vector<192x128xbf16>, vector<8x128xf32> -> vector<8x128xf32>
    %c0_61 = arith.constant 0 : index
    %c0_62 = arith.constant 0 : index
    %89 = vector.load %arg5[%c0_61, %c0_62] : memref<1x128xf32, #tpu.memory_space<vmem>>, vector<1x128xf32>
    %90 = vector.broadcast %89 : vector<1x128xf32> to vector<8x128xf32>
    %91 = arith.addf %88, %90 : vector<8x128xf32>
    %92 = tpu.iota {dimensions = array<i32: 1>} : vector<8x128xi32>
    %c4_i32 = arith.constant 4 : i32
    %93 = vector.broadcast %c4_i32 : i32 to vector<8x128xi32>
    %94 = arith.cmpi slt, %92, %93 : vector<8x128xi32>
    %95 = arith.mulf %91, %91 : vector<8x128xf32>
    %cst_63 = arith.constant 0.000000e+00 : f32
    %96 = vector.broadcast %cst_63 : f32 to vector<8x128xf32>
    %97 = arith.select %94, %95, %96 : vector<8x128xi1>, vector<8x128xf32>
    %cst_64 = arith.constant dense<0.000000e+00> : vector<8xf32>
    %98 = vector.multi_reduction <add>, %97, %cst_64 [1] : vector<8x128xf32> to vector<8xf32>
    %99 = vector.shape_cast %98 : vector<8xf32> to vector<8x1xf32>
    %cst_65 = arith.constant 1.000000e-24 : f32
    %100 = vector.broadcast %cst_65 : f32 to vector<8x1xf32>
    %101 = arith.maximumf %99, %100 : vector<8x1xf32>
    %102 = math.rsqrt %101 : vector<8x1xf32>
    %103 = vector.broadcast %102 : vector<8x1xf32> to vector<8x128xf32>
    %104 = arith.mulf %91, %103 : vector<8x128xf32>
    %105 = arith.select %94, %104, %91 : vector<8x128xi1>, vector<8x128xf32>
    %c0_66 = arith.constant 0 : index
    %c0_67 = arith.constant 0 : index
    %106 = vector.load %arg6[%c0_66, %c0_67] : memref<8x128xf32, #tpu.memory_space<vmem>>, vector<8x128xf32>
    tpu.vector_store %arg6[%c0_66, %c0_67], %105 {strides = array<i32>} : memref<8x128xf32, #tpu.memory_space<vmem>>, vector<8x128xf32>,
    return
  }
  func.func @transform_0(%arg0: i32) -> (i32, i32) {
    %c0_i32 = arith.constant 0 : i32
    %c0_i32_0 = arith.constant 0 : i32
    return %arg0, %c0_i32 : i32, i32
  }
  func.func @transform_1(%arg0: i32) -> (i32, i32, i32) {
    %c0_i32 = arith.constant 0 : i32
    %c0_i32_0 = arith.constant 0 : i32
    %c0_i32_1 = arith.constant 0 : i32
    %c0_i32_2 = arith.constant 0 : i32
    return %c0_i32, %c0_i32_0, %c0_i32_1 : i32, i32, i32
  }
  func.func @transform_2(%arg0: i32) -> (i32, i32, i32) {
    %c0_i32 = arith.constant 0 : i32
    %c0_i32_0 = arith.constant 0 : i32
    %c0_i32_1 = arith.constant 0 : i32
    %c0_i32_2 = arith.constant 0 : i32
    return %c0_i32, %c0_i32_0, %c0_i32_1 : i32, i32, i32
  }
  func.func @transform_3(%arg0: i32) -> (i32, i32) {
    %c0_i32 = arith.constant 0 : i32
    %c0_i32_0 = arith.constant 0 : i32
    %c0_i32_1 = arith.constant 0 : i32
    return %c0_i32, %c0_i32_0 : i32, i32
  }
  func.func @transform_4(%arg0: i32) -> (i32, i32) {
    %c0_i32 = arith.constant 0 : i32
    %c0_i32_0 = arith.constant 0 : i32
    %c0_i32_1 = arith.constant 0 : i32
    return %c0_i32, %c0_i32_0 : i32, i32
  }
  func.func @transform_5(%arg0: i32) -> (i32, i32) {
    %c0_i32 = arith.constant 0 : i32
    %c0_i32_0 = arith.constant 0 : i32
    return %arg0, %c0_i32 : i32, i32
  }
}

</mosaic_0001>

<bundles_post_ra>
// kernel: tpu_custom_call.1
= control target key start
LH: loop header
LB: loop body
LE: loop exit
PB: predicated region body
PF: predicated region fallthrough
CT: control target
= control target key end

     0   :  { %10 = vsyncpa [#allocation3], 0  ;;  %s2707_s0 = inlined_call_operand.hbm [shape: f32[8,192], index: 0, kind: input, shape index: {}]   ;;  %s2708_s1 = inlined_call_operand.hbm [shape: bf16[8,192,192], index: 1, kind: input, shape index: {}]   ;;  %s2709_s2 = inlined_call_operand.hbm [shape: f32[8,1,192], index: 2, kind: input, shape index: {}]   ;;  %s2710_s3 = inlined_call_operand.hbm [shape: bf16[192,128], index: 3, kind: input, shape index: {}]   ;;  %s2711_s4 = inlined_call_operand.vmem [shape: f32[1,128], index: 4, kind: input, shape index: {}]   ;;  %s2712_s5 = inlined_call_operand.hbm [shape: f32[8,128], index: 5, kind: output, shape index: {}]  }
   0x1   :  { %11 = vsyncpa [#allocation6], 0 }
   0x2   :  { %12 = vsyncpa [#allocation9], 0 }
   0x3   :  { %13 = vsyncpa [#allocation4], 0  ;;  %s2555_s18 = smov [#allocation5]   ;;  %s2437_s22 = scalar_lea.hbm %s2708_s1, 24576 }
   0x4   :  { %s29_s19 = sshll.u32 %s2555_s18, 4  ;;  %p2438_p0 = scmp.ne.s32.totalorder %s2708_s1, %s2437_s22  ;;  %s30_s19 = int_to_ptr.vmem [resolvable:$true] %s29_s19 }
   0x5   :  { %p2441_p1 = scmp.lt.u32.totalorder %s2437_s22, %s2708_s1 }
   0x7   :  { %p2443_p2 = pnand %p2441_p1, %p2438_p0 }
   0x9   :  { %2446 = shalt.err (!%p2443_p2)
}
   0xa   :  { %s2447_s27 = scalar_lea.vmem %s30_s19, 24576  ;;  %p2452_p4 = scmp.lt.s32.totalorder %s30_s19, %s30_s19 }
   0xb   :  { %p2448_p3 = scmp.ne.s32.totalorder %s30_s19, %s2447_s27  ;;  %p2453_p5 = scmp.lt.s32.totalorder %s2447_s27, %s2447_s27 }
   0xd   :  { %p2454_p6 = por %p2453_p5, %p2452_p4 }
   0xf   :  { %p2455_p7 = pnand %p2454_p6, %p2448_p3 }
  0x11   :  { %2458 = shalt.err (!%p2455_p7)
}
  0x12   :  { %s2556_s28 = smov 128   ;;  %s2557_s29 = smov 8  }
  0x13   :  { %35 = dma.hbm_to_vmem [thread:$0]  %s2708_s1, 24576, %s30_s19, [#allocation6], %s2556_s28, %s2556_s28, %s2557_s29  }
  0x14   :  { %s2558_s7 = smov [#allocation2]   ;;  %s2559_s9 = smov [#allocation7]  }
  0x15   :  { %s20_s8 = sshll.u32 %s2558_s7, 4  ;;  %s41_s10 = sshll.u32 %s2559_s9, 4  ;;  %s21_s8 = int_to_ptr.vmem [resolvable:$true] %s20_s8  ;;  %s42_s10 = int_to_ptr.vmem [resolvable:$true] %s41_s10 }
  0x16   :  { %s2459_s13 = scalar_lea.hbm %s2707_s0, 256 }
  0x17   :  { %p2460_p8 = scmp.ne.s32.totalorder %s2707_s0, %s2459_s13  ;;  %p2463_p9 = scmp.lt.u32.totalorder %s2459_s13, %s2707_s0 }
  0x19   :  { %p2465_p10 = pnand %p2463_p9, %p2460_p8 }
  0x1b   :  { %2468 = shalt.err (!%p2465_p10)
}
  0x1c   :  { %s2469_s1 = scalar_lea.vmem %s21_s8, 256  ;;  %p2474_p12 = scmp.lt.s32.totalorder %s21_s8, %s21_s8 }
  0x1d   :  { %p2470_p11 = scmp.ne.s32.totalorder %s21_s8, %s2469_s1  ;;  %p2475_p13 = scmp.lt.s32.totalorder %s2469_s1, %s2469_s1 }
  0x1f   :  { %p2476_p0 = por %p2475_p13, %p2474_p12 }
  0x21   :  { %p2477_p1 = pnand %p2476_p0, %p2470_p11 }
  0x23   :  { %2480 = shalt.err (!%p2477_p1)
}
  0x24   :  { %23 = dma.hbm_to_vmem [thread:$0]  %s2707_s0, 256, %s21_s8, [#allocation3]  }
  0x25   :  { %s2481_s22 = scalar_lea.hbm %s2709_s2, 256 }
  0x26   :  { %p2482_p2 = scmp.ne.s32.totalorder %s2709_s2, %s2481_s22  ;;  %p2485_p3 = scmp.lt.u32.totalorder %s2481_s22, %s2709_s2 }
  0x28   :  { %p2487_p4 = pnand %p2485_p3, %p2482_p2 }
  0x2a   :  { %2490 = shalt.err (!%p2487_p4)
}
  0x2b   :  { %s2491_s27 = scalar_lea.vmem %s42_s10, 256  ;;  %p2496_p6 = scmp.lt.s32.totalorder %s42_s10, %s42_s10 }
  0x2c   :  { %p2492_p5 = scmp.ne.s32.totalorder %s42_s10, %s2491_s27  ;;  %p2497_p7 = scmp.lt.s32.totalorder %s2491_s27, %s2491_s27 }
  0x2e   :  { %p2498_p8 = por %p2497_p7, %p2496_p6 }
  0x30   :  { %p2499_p9 = pnand %p2498_p8, %p2492_p5 }
  0x32   :  { %2502 = shalt.err (!%p2499_p9)
}
  0x33   :  { %s2560_s0 = smov 32   ;;  %s2561_s28 = smov 2  }
  0x34   :  { %47 = dma.hbm_to_vmem [thread:$0]  %s2709_s2, 256, %s42_s10, [#allocation6], %s2560_s0, %s2560_s0, %s2561_s28  }
  0x35   :  { %s2562_s6 = smov [#allocation8]   ;;  %s2503_s11 = scalar_lea.hbm %s2710_s3, 1536 }
  0x36   :  { %s53_s7 = sshll.u32 %s2562_s6, 4  ;;  %p2504_p10 = scmp.ne.s32.totalorder %s2710_s3, %s2503_s11  ;;  %s54_s7 = int_to_ptr.vmem [resolvable:$true] %s53_s7 }
  0x37   :  { %p2507_p11 = scmp.lt.u32.totalorder %s2503_s11, %s2710_s3 }
  0x39   :  { %p2509_p12 = pnand %p2507_p11, %p2504_p10 }
  0x3b   :  { %2512 = shalt.err (!%p2509_p12)
}
  0x3c   :  { %s2513_s16 = scalar_lea.vmem %s54_s7, 1536  ;;  %p2518_p0 = scmp.lt.s32.totalorder %s54_s7, %s54_s7 }
  0x3d   :  { %p2514_p13 = scmp.ne.s32.totalorder %s54_s7, %s2513_s16  ;;  %p2519_p1 = scmp.lt.s32.totalorder %s2513_s16, %s2513_s16 }
  0x3f   :  { %p2520_p2 = por %p2519_p1, %p2518_p0 }
  0x41   :  { %p2521_p3 = pnand %p2520_p2, %p2514_p13 }
  0x43   :  { %2524 = shalt.err (!%p2521_p3)
}
  0x44   :  { %s2563_s2 = smov 64   ;;  %s2564_s10 = smov 4  }
  0x45   :  { %59 = dma.hbm_to_vmem [thread:$0]  %s2710_s3, 1536, %s54_s7, [#allocation9], %s2563_s2, %s2563_s2, %s2564_s10  }
  0x46   :  { %2547 = dma.done.wait [#allocation3], 256  }
  0x47   :  { %2548 = vsyncadd [#allocation3], 4294967040 }
  0x48   :  { %2549 = dma.done.wait [#allocation6], 24832  }
  0x49   :  { %2550 = vsyncadd [#allocation6], 4294942464 }
  0x4a   :  { %2551 = dma.done.wait [#allocation9], 1536  }
  0x4b   :  { %2552 = vsyncadd [#allocation9], 4294965760  ;;  %v2135_v0 = vld [vmem:[#allocation5 + $0x4] ss:$8 sps:$4 sm:$0xff]   ;;  %v2137_v1 = vld [vmem:[#allocation5] ss:$8 sps:$4 sm:$0xff]  }
  0x4c   :  { %239 = vmatprep.subr.bf16.mxu0 %v2135_v0  ;;  %v2138_v2 = vld [vmem:[#allocation5 + $0x14] ss:$8 sps:$4 sm:$0xff]   ;;  %v2140_v3 = vld [vmem:[#allocation5 + $0x10] ss:$8 sps:$4 sm:$0xff]   ;;  %v2141_v4 = vld [vmem:[#allocation5 + $0x24] ss:$8 sps:$4 sm:$0xff]  }
  0x4d   :  { %240 = vmatpush1.bf16.msra.mxu0 %v2137_v1  ;;  %v2143_v5 = vld [vmem:[#allocation5 + $0x20] ss:$8 sps:$4 sm:$0xff]   ;;  %v2144_v6 = vld [vmem:[#allocation5 + $0x34] ss:$8 sps:$4 sm:$0xff]   ;;  %v2146_v7 = vld [vmem:[#allocation5 + $0x30] ss:$8 sps:$4 sm:$0xff]  }
  0x4e   :  { %241 = vmatprep.subr.bf16.mxu0 %v2138_v2  ;;  %v2147_v8 = vld [vmem:[#allocation5 + $0x44] ss:$8 sps:$4 sm:$0xff]   ;;  %v2149_v9 = vld [vmem:[#allocation5 + $0x40] ss:$8 sps:$4 sm:$0xff]   ;;  %v2150_v10 = vld [vmem:[#allocation5 + $0x54] ss:$8 sps:$4 sm:$0xff]  }
  0x4f   :  { %v76_v11 = vld [vmem:[#allocation2 + $0x8] sm:$0xff]  ;;  %vm235_vm0 = vcmask 523264   ;;  %v2171_v13 = vld [vmem:[#allocation5 + $0xc4] ss:$8 sps:$4 sm:$0xff]   ;;  %v2173_v14 = vld [vmem:[#allocation5 + $0xc0] ss:$8 sps:$4 sm:$0xff]  }
  0x50   :  { %v78_v12 = vpack.c.bf16 %v76_v11, %v76_v11  ;;  %v2174_v15 = vld [vmem:[#allocation5 + $0xd4] ss:$8 sps:$4 sm:$0xff]   ;;  %v2152_v16 = vld [vmem:[#allocation5 + $0x50] ss:$8 sps:$4 sm:$0xff]   ;;  %v2153_v17 = vld [vmem:[#allocation5 + $0x64] ss:$8 sps:$4 sm:$0xff]   ;;  %445 = vmatprep.subr.bf16.mxu1 %v2171_v13 }
  0x51   :  { %242 = vmatpush1.bf16.msra.mxu0 %v2140_v3  ;;  %446 = vmatpush1.bf16.msra.mxu1 %v2173_v14  ;;  %v2176_v18 = vld [vmem:[#allocation5 + $0xd0] ss:$8 sps:$4 sm:$0xff]   ;;  %v2177_v19 = vld [vmem:[#allocation5 + $0xe4] ss:$8 sps:$4 sm:$0xff]   ;;  %v2155_v20 = vld [vmem:[#allocation5 + $0x60] ss:$8 sps:$4 sm:$0xff]  }
  0x52   :  { %243 = vmatprep.subr.bf16.mxu0 %v2141_v4  ;;  %1933 = vmatprep.mubr.msk.bf16.mxu0 %vm235_vm0, %v78_v12  ;;  %v2156_v21 = vld [vmem:[#allocation5 + $0x74] ss:$8 sps:$4 sm:$0xff]   ;;  %v2179_v22 = vld [vmem:[#allocation5 + $0xe0] ss:$8 sps:$4 sm:$0xff]   ;;  %v2158_v24 = vld [vmem:[#allocation5 + $0x70] ss:$8 sps:$4 sm:$0xff]  }
  0x53   :  { %447 = vmatprep.subr.bf16.mxu1 %v2174_v15  ;;  %v2180_v23 = vld [vmem:[#allocation5 + $0xf4] ss:$8 sps:$4 sm:$0xff]   ;;  %v2159_v25 = vld [vmem:[#allocation5 + $0x84] ss:$8 sps:$4 sm:$0xff]   ;;  %v2161_v26 = vld [vmem:[#allocation5 + $0x80] ss:$8 sps:$4 sm:$0xff]  }
  0x54   :  { %v2182_v27 = vld [vmem:[#allocation5 + $0xf0] ss:$8 sps:$4 sm:$0xff]   ;;  %v2162_v28 = vld [vmem:[#allocation5 + $0x94] ss:$8 sps:$4 sm:$0xff]   ;;  %v2183_v29 = vld [vmem:[#allocation5 + $0x104] ss:$8 sps:$4 sm:$0xff]  }
  0x55   :  { %244 = vmatpush1.bf16.msra.mxu0 %v2143_v5  ;;  %448 = vmatpush1.bf16.msra.mxu1 %v2176_v18  ;;  %v2185_v30 = vld [vmem:[#allocation5 + $0x100] ss:$8 sps:$4 sm:$0xff]   ;;  %v2186_v31 = vld [vmem:[#allocation5 + $0x114] ss:$8 sps:$4 sm:$0xff]   ;;  %v2164_v32 = vld [vmem:[#allocation5 + $0x90] ss:$8 sps:$4 sm:$0xff]  }
  0x56   :  { %245 = vmatprep.subr.bf16.mxu0 %v2144_v6  ;;  %449 = vmatprep.subr.bf16.mxu1 %v2177_v19  ;;  %v2165_v33 = vld [vmem:[#allocation5 + $0xa4] ss:$8 sps:$4 sm:$0xff]   ;;  %v2188_v34 = vld [vmem:[#allocation5 + $0x110] ss:$8 sps:$4 sm:$0xff]   ;;  %v2167_v36 = vld [vmem:[#allocation5 + $0xa0] ss:$8 sps:$4 sm:$0xff]  }
  0x57   :  { %v2189_v35 = vld [vmem:[#allocation5 + $0x124] ss:$8 sps:$4 sm:$0xff]   ;;  %v2168_v37 = vld [vmem:[#allocation5 + $0xb4] ss:$8 sps:$4 sm:$0xff]   ;;  %v2191_v38 = vld [vmem:[#allocation5 + $0x120] ss:$8 sps:$4 sm:$0xff]  }
  0x58   :  { %v2192_v39 = vld [vmem:[#allocation5 + $0x134] ss:$8 sps:$4 sm:$0xff]   ;;  %v2170_v40 = vld [vmem:[#allocation5 + $0xb0] ss:$8 sps:$4 sm:$0xff]   ;;  %v2195_v43 = vld [vmem:[#allocation5 + $0x144] ss:$8 sps:$4 sm:$0xff]  }
  0x59   :  { %246 = vmatpush1.bf16.msra.mxu0 %v2146_v7  ;;  %450 = vmatpush1.bf16.msra.mxu1 %v2179_v22  ;;  %v75_v41 = vld [vmem:[#allocation2] sm:$0xff]  ;;  %v2197_v45 = vld [vmem:[#allocation5 + $0x140] ss:$8 sps:$4 sm:$0xff]   ;;  %v2201_v48 = vld [vmem:[#allocation5 + $0x164] ss:$8 sps:$4 sm:$0xff]   ;;  %s2566_s19 = smov [#allocation10]  }
  0x5a   :  { %247 = vmatprep.subr.bf16.mxu0 %v2147_v8  ;;  %451 = vmatprep.subr.bf16.mxu1 %v2180_v23  ;;  %v2194_v42 = vld [vmem:[#allocation5 + $0x130] ss:$8 sps:$4 sm:$0xff]   ;;  %v77_v44 = vpack.c.bf16 %v75_v41, %v75_v41  ;;  %v2198_v46 = vld [vmem:[#allocation5 + $0x154] ss:$8 sps:$4 sm:$0xff]   ;;  %v2203_v49 = vld [vmem:[#allocation5 + $0x160] ss:$8 sps:$4 sm:$0xff]   ;;  %v105_v8 = vlaneseq }
  0x5b   :  { %v2200_v47 = vld [vmem:[#allocation5 + $0x150] ss:$8 sps:$4 sm:$0xff]   ;;  %v2204_v50 = vld [vmem:[#allocation5 + $0x174] ss:$8 sps:$4 sm:$0xff]   ;;  %v2207_v52 = vld [vmem:[#allocation5 + $0x180] ss:$8 sps:$4 sm:$0xff]  }
  0x5c   :  { %v2206_v51 = vld [vmem:[#allocation5 + $0x170] ss:$8 sps:$4 sm:$0xff]   ;;  %v2209_v53 = vld [vmem:[#allocation5 + $0x184] ss:$8 sps:$4 sm:$0xff]   ;;  %v2212_v54 = vld [vmem:[#allocation5 + $0x194] ss:$8 sps:$4 sm:$0xff]  }
  0x5d   :  { %248 = vmatpush1.bf16.msra.mxu0 %v2149_v9  ;;  %452 = vmatpush1.bf16.msra.mxu1 %v2182_v27  ;;  %v2210_v55 = vld [vmem:[#allocation5 + $0x190] ss:$8 sps:$4 sm:$0xff]   ;;  %v2215_v56 = vld [vmem:[#allocation5 + $0x1a4] ss:$8 sps:$4 sm:$0xff]   ;;  %v2213_v57 = vld [vmem:[#allocation5 + $0x1a0] ss:$8 sps:$4 sm:$0xff]  }
  0x5e   :  { %249 = vmatprep.subr.bf16.mxu0 %v2150_v10  ;;  %453 = vmatprep.subr.bf16.mxu1 %v2183_v29  ;;  %v2218_v58 = vld [vmem:[#allocation5 + $0x1b4] ss:$8 sps:$4 sm:$0xff]   ;;  %v2216_v59 = vld [vmem:[#allocation5 + $0x1b0] ss:$8 sps:$4 sm:$0xff]   ;;  %v2221_v60 = vld [vmem:[#allocation5 + $0x1c4] ss:$8 sps:$4 sm:$0xff]  }
  0x5f   :  { %v2219_v61 = vld [vmem:[#allocation5 + $0x1c0] ss:$8 sps:$4 sm:$0xff]   ;;  %v2224_v62 = vld [vmem:[#allocation5 + $0x1d4] ss:$8 sps:$4 sm:$0xff]   ;;  %v2222_v63 = vld [vmem:[#allocation5 + $0x1d0] ss:$8 sps:$4 sm:$0xff]  }
  0x60   :  { %v2227_v0 = vld [vmem:[#allocation5 + $0x1e4] ss:$8 sps:$4 sm:$0xff]   ;;  %v2225_v1 = vld [vmem:[#allocation5 + $0x1e0] ss:$8 sps:$4 sm:$0xff]   ;;  %v2230_v2 = vld [vmem:[#allocation5 + $0x1f4] ss:$8 sps:$4 sm:$0xff]  }
  0x61   :  { %250 = vmatpush1.bf16.msra.mxu0 %v2152_v16  ;;  %454 = vmatpush1.bf16.msra.mxu1 %v2185_v30  ;;  %v2228_v3 = vld [vmem:[#allocation5 + $0x1f0] ss:$8 sps:$4 sm:$0xff]   ;;  %v2233_v4 = vld [vmem:[#allocation5 + $0x204] ss:$8 sps:$4 sm:$0xff]   ;;  %v2231_v5 = vld [vmem:[#allocation5 + $0x200] ss:$8 sps:$4 sm:$0xff]  }
  0x62   :  { %251 = vmatprep.subr.bf16.mxu0 %v2153_v17  ;;  %455 = vmatprep.subr.bf16.mxu1 %v2186_v31  ;;  %v2236_v6 = vld [vmem:[#allocation5 + $0x214] ss:$8 sps:$4 sm:$0xff]   ;;  %v2234_v7 = vld [vmem:[#allocation5 + $0x210] ss:$8 sps:$4 sm:$0xff]   ;;  %v106_v9 = vshrl.u32 %v105_v8, 7  ;;  %s1898_s20 = sshll.u32 %s2566_s19, 4  ;;  %s1899_s20 = int_to_ptr.vmem [resolvable:$true] %s1898_s20 }
  0x63   :  { %v103_v11 = vld [vmem:[#allocation7] sm:$0x3]  ;;  %v2242_v27 = vld [vmem:[#allocation5 + $0x234] ss:$8 sps:$4 sm:$0xff]   ;;  %v2245_v30 = vld [vmem:[#allocation5 + $0x244] ss:$8 sps:$4 sm:$0xff]   ;;  %p2530_p5 = scmp.lt.s32.totalorder %s1899_s20, %s1899_s20 }
  0x64   :  { %v2647_v10 = vsub.s32 0, %v106_v9  ;;  %v2649_v12 = vsub.s32 1, %v106_v9  ;;  %v2243_v29 = vld [vmem:[#allocation5 + $0x240] ss:$8 sps:$4 sm:$0xff]   ;;  %v2248_v31 = vld [vmem:[#allocation5 + $0x254] ss:$8 sps:$4 sm:$0xff]  }
  0x65   :  { %252 = vmatpush1.bf16.msra.mxu0 %v2155_v20  ;;  %456 = vmatpush1.bf16.msra.mxu1 %v2188_v34  ;;  %v2249_v34 = vld [vmem:[#allocation5 + $0x260] ss:$8 sps:$4 sm:$0xff]   ;;  %v2263_v41 = vld [vmem:[#allocation5 + $0x2a4] ss:$8 sps:$4 sm:$0xff]   ;;  %v2290_v9 = vld [vmem:[#allocation5 + $0x334] ss:$8 sps:$4 sm:$0xff]  }
  0x66   :  { %253 = vmatprep.subr.bf16.mxu0 %v2156_v21  ;;  %457 = vmatprep.subr.bf16.mxu1 %v2189_v35  ;;  %v108_v13 = vrot.slane %v103_v11, %v2647_v10  ;;  %v112_v14 = vrot.slane %v103_v11, %v2649_v12  ;;  %v2254_v35 = vld [vmem:[#allocation5 + $0x274] ss:$8 sps:$4 sm:$0xff]   ;;  %v2288_v11 = vld [vmem:[#allocation5 + $0x330] ss:$8 sps:$4 sm:$0xff]  }
  0x69   :  { %254 = vmatpush1.bf16.msra.mxu0 %v2158_v24  ;;  %458 = vmatpush1.bf16.msra.mxu1 %v2191_v38  ;;  %v2255_v38 = vld [vmem:[#allocation5 + $0x280] ss:$8 sps:$4 sm:$0xff]  }
  0x6a   :  { %255 = vmatprep.subr.bf16.mxu0 %v2159_v25  ;;  %459 = vmatprep.subr.bf16.mxu1 %v2192_v39  ;;  %v2239_v25 = vld [vmem:[#allocation5 + $0x224] ss:$8 sps:$4 sm:$0xff]   ;;  %v2260_v39 = vld [vmem:[#allocation5 + $0x294] ss:$8 sps:$4 sm:$0xff]  }
  0x6d   :  { %256 = vmatpush1.bf16.msra.mxu0 %v2161_v26  ;;  %460 = vmatpush1.bf16.msra.mxu1 %v2194_v42  ;;  %v2237_v26 = vld [vmem:[#allocation5 + $0x220] ss:$8 sps:$4 sm:$0xff]  }
  0x6e   :  { %257 = vmatprep.subr.bf16.mxu0 %v2162_v28  ;;  %461 = vmatprep.subr.bf16.mxu1 %v2195_v43  ;;  %v2240_v28 = vld [vmem:[#allocation5 + $0x230] ss:$8 sps:$4 sm:$0xff]   ;;  %v2261_v42 = vld [vmem:[#allocation5 + $0x2a0] ss:$8 sps:$4 sm:$0xff]   ;;  %v2266_v43 = vld [vmem:[#allocation5 + $0x2b4] ss:$8 sps:$4 sm:$0xff]  }
  0x71   :  { %258 = vmatpush1.bf16.msra.mxu0 %v2164_v32  ;;  %462 = vmatpush1.bf16.msra.mxu1 %v2197_v45  ;;  %v2246_v32 = vld [vmem:[#allocation5 + $0x250] ss:$8 sps:$4 sm:$0xff]   ;;  %v2269_v45 = vld [vmem:[#allocation5 + $0x2c4] ss:$8 sps:$4 sm:$0xff]  }
  0x72   :  { %259 = vmatprep.subr.bf16.mxu0 %v2165_v33  ;;  %463 = vmatprep.subr.bf16.mxu1 %v2198_v46  ;;  %v2251_v33 = vld [vmem:[#allocation5 + $0x264] ss:$8 sps:$4 sm:$0xff]   ;;  %v2267_v46 = vld [vmem:[#allocation5 + $0x2c0] ss:$8 sps:$4 sm:$0xff]  }
  0x75   :  { %260 = vmatpush1.bf16.msra.mxu0 %v2167_v36  ;;  %464 = vmatpush1.bf16.msra.mxu1 %v2200_v47  ;;  %v2252_v36 = vld [vmem:[#allocation5 + $0x270] ss:$8 sps:$4 sm:$0xff]   ;;  %v2272_v47 = vld [vmem:[#allocation5 + $0x2d4] ss:$8 sps:$4 sm:$0xff]  }
  0x76   :  { %261 = vmatprep.subr.bf16.mxu0 %v2168_v37  ;;  %465 = vmatprep.subr.bf16.mxu1 %v2201_v48  ;;  %v2257_v37 = vld [vmem:[#allocation5 + $0x284] ss:$8 sps:$4 sm:$0xff]   ;;  %v2270_v48 = vld [vmem:[#allocation5 + $0x2d0] ss:$8 sps:$4 sm:$0xff]  }
  0x79   :  { %262 = vmatpush1.bf16.msra.mxu0 %v2170_v40  ;;  %466 = vmatpush1.bf16.msra.mxu1 %v2203_v49  ;;  %v2258_v40 = vld [vmem:[#allocation5 + $0x290] ss:$8 sps:$4 sm:$0xff]   ;;  %v310_v49 = vld [vmem:[#allocation7 + $0x2] sm:$0x3] }
  0x7a   :  { %467 = vmatprep.subr.bf16.mxu1 %v2204_v50  ;;  %651 = vmatprep.subr.bf16.mxu0 %v2209_v53  ;;  %v315_v50 = vrot.slane %v310_v49, %v2647_v10 }
  0x7c   :  { %272 = vmatmul.mubr.bf16.vlgmr.msra.gmra.mrb[0].mxu0 %v77_v44  ;;  %v2264_v44 = vld [vmem:[#allocation5 + $0x2b0] ss:$8 sps:$4 sm:$0xff]  }
  0x7d   :  { %468 = vmatpush1.bf16.msra.mxu1 %v2206_v51  ;;  %652 = vmatpush1.bf16.msra.mxu0 %v2207_v52  ;;  %v319_v51 = vrot.slane %v310_v49, %v2649_v12  ;;  %v2324_v49 = vld [vmem:[#allocation5 + $0x3f0] ss:$8 sps:$4 sm:$0xff]  }
  0x7e   :  { %653 = vmatprep.subr.bf16.mxu0 %v2212_v54  ;;  %857 = vmatprep.subr.bf16.mxu1 %v2245_v30 }
  0x81   :  { %654 = vmatpush1.bf16.msra.mxu0 %v2210_v55 }
  0x82   :  { %655 = vmatprep.subr.bf16.mxu0 %v2215_v56 }
  0x85   :  { %656 = vmatpush1.bf16.msra.mxu0 %v2213_v57 }
  0x86   :  { %657 = vmatprep.subr.bf16.mxu0 %v2218_v58 }
  0x89   :  { %658 = vmatpush1.bf16.msra.mxu0 %v2216_v59 }
  0x8a   :  { %659 = vmatprep.subr.bf16.mxu0 %v2221_v60 }
  0x8d   :  { %660 = vmatpush1.bf16.msra.mxu0 %v2219_v61 }
  0x8e   :  { %661 = vmatprep.subr.bf16.mxu0 %v2224_v62  ;;  %v2275_v62 = vld [vmem:[#allocation5 + $0x2e4] ss:$8 sps:$4 sm:$0xff]  }
  0x91   :  { %662 = vmatpush1.bf16.msra.mxu0 %v2222_v63  ;;  %v2273_v63 = vld [vmem:[#allocation5 + $0x2e0] ss:$8 sps:$4 sm:$0xff]  }
  0x92   :  { %663 = vmatprep.subr.bf16.mxu0 %v2227_v0  ;;  %v2278_v0 = vld [vmem:[#allocation5 + $0x2f4] ss:$8 sps:$4 sm:$0xff]  }
  0x95   :  { %664 = vmatpush1.bf16.msra.mxu0 %v2225_v1  ;;  %v2276_v1 = vld [vmem:[#allocation5 + $0x2f0] ss:$8 sps:$4 sm:$0xff]  }
  0x96   :  { %665 = vmatprep.subr.bf16.mxu0 %v2230_v2  ;;  %v2279_v2 = vld [vmem:[#allocation5 + $0x300] ss:$8 sps:$4 sm:$0xff]  }
  0x99   :  { %666 = vmatpush1.bf16.msra.mxu0 %v2228_v3  ;;  %v2281_v3 = vld [vmem:[#allocation5 + $0x304] ss:$8 sps:$4 sm:$0xff]  }
  0x9a   :  { %667 = vmatprep.subr.bf16.mxu0 %v2233_v4  ;;  %v2284_v4 = vld [vmem:[#allocation5 + $0x314] ss:$8 sps:$4 sm:$0xff]  }
  0x9d   :  { %668 = vmatpush1.bf16.msra.mxu0 %v2231_v5  ;;  %v2282_v5 = vld [vmem:[#allocation5 + $0x310] ss:$8 sps:$4 sm:$0xff]  }
  0x9e   :  { %669 = vmatprep.subr.bf16.mxu0 %v2236_v6  ;;  %v2287_v6 = vld [vmem:[#allocation5 + $0x324] ss:$8 sps:$4 sm:$0xff]  }
  0xa1   :  { %670 = vmatpush1.bf16.msra.mxu0 %v2234_v7  ;;  %v2285_v7 = vld [vmem:[#allocation5 + $0x320] ss:$8 sps:$4 sm:$0xff]  }
  0xa2   :  { %671 = vmatprep.subr.bf16.mxu0 %v2239_v25 }
  0xa5   :  { %672 = vmatpush1.bf16.msra.mxu0 %v2237_v26 }
  0xa6   :  { %673 = vmatprep.subr.bf16.mxu0 %v2242_v27 }
  0xa9   :  { %674 = vmatpush1.bf16.msra.mxu0 %v2240_v28 }
  0xaa   :  { %1069 = vmatprep.subr.bf16.mxu0 %v2281_v3 }
 0x14f   :  { %v273_v15 = vpop.f32.mrb[0].mxu0 }
 0x150   :  { %v274_v16 = vadd.f32 %v273_v15, %v108_v13  ;;  %v275_v17 = vpop.f32.mrb[1].mxu0  ;;  %v2293_v13 = vld [vmem:[#allocation5 + $0x344] ss:$8 sps:$4 sm:$0xff]   ;;  %v2296_v15 = vld [vmem:[#allocation5 + $0x354] ss:$8 sps:$4 sm:$0xff]  }
 0x151   :  { %v276_v18 = vadd.f32 %v275_v17, %v112_v14  ;;  %v277_v19 = vpop.f32.mrb[2].mxu0  ;;  %v2291_v14 = vld [vmem:[#allocation5 + $0x340] ss:$8 sps:$4 sm:$0xff]   ;;  %v2299_v17 = vld [vmem:[#allocation5 + $0x364] ss:$8 sps:$4 sm:$0xff]  }
 0x152   :  { %v280_v20 = vmax.f32 %v274_v16, 0.0  ;;  %v278_v21 = vpop.f32.mrb[3].mxu0  ;;  %v2294_v16 = vld [vmem:[#allocation5 + $0x350] ss:$8 sps:$4 sm:$0xff]   ;;  %v2302_v19 = vld [vmem:[#allocation5 + $0x374] ss:$8 sps:$4 sm:$0xff]  }
 0x153   :  { %v281_v22 = vmax.f32 %v276_v18, 0.0  ;;  %v2297_v18 = vld [vmem:[#allocation5 + $0x360] ss:$8 sps:$4 sm:$0xff]   ;;  %v2305_v21 = vld [vmem:[#allocation5 + $0x384] ss:$8 sps:$4 sm:$0xff]  }
 0x154   :  { %v282_v24 = vpack.c.bf16 %v280_v20, %v280_v20  ;;  %v2300_v20 = vld [vmem:[#allocation5 + $0x370] ss:$8 sps:$4 sm:$0xff]  }
 0x155   :  { %v283_v23 = vpack.c.bf16 %v281_v22, %v281_v22  ;;  %v2303_v22 = vld [vmem:[#allocation5 + $0x380] ss:$8 sps:$4 sm:$0xff]  }
 0x157   :  { %1958 = vmatprep.mubr.msk.bf16.mxu1 %vm235_vm0, %v283_v23  ;;  %v516_v23 = vld [vmem:[#allocation7 + $0x4] sm:$0x3] }
 0x158   :  { %478 = vmatmul.mubr.bf16.vlgmr.msra.gmra.mrb[0].mxu1 %v282_v24  ;;  %v521_v24 = vrot.slane %v516_v23, %v2647_v10  ;;  %v525_v25 = vrot.slane %v516_v23, %v2649_v12  ;;  %v2353_v23 = vld [vmem:[#allocation5 + $0x484] ss:$8 sps:$4 sm:$0xff]  }
 0x159   :  { %858 = vmatpush1.bf16.msra.mxu1 %v2243_v29 }
 0x15a   :  { %859 = vmatprep.subr.bf16.mxu1 %v2248_v31 }
 0x15d   :  { %860 = vmatpush1.bf16.msra.mxu1 %v2246_v32 }
 0x15e   :  { %861 = vmatprep.subr.bf16.mxu1 %v2251_v33 }
 0x161   :  { %862 = vmatpush1.bf16.msra.mxu1 %v2249_v34 }
 0x162   :  { %863 = vmatprep.subr.bf16.mxu1 %v2254_v35 }
 0x165   :  { %864 = vmatpush1.bf16.msra.mxu1 %v2252_v36  ;;  %v2308_v36 = vld [vmem:[#allocation5 + $0x394] ss:$8 sps:$4 sm:$0xff]  }
 0x166   :  { %865 = vmatprep.subr.bf16.mxu1 %v2257_v37  ;;  %v2306_v37 = vld [vmem:[#allocation5 + $0x390] ss:$8 sps:$4 sm:$0xff]  }
 0x169   :  { %866 = vmatpush1.bf16.msra.mxu1 %v2255_v38  ;;  %v2311_v38 = vld [vmem:[#allocation5 + $0x3a4] ss:$8 sps:$4 sm:$0xff]  }
 0x16a   :  { %867 = vmatprep.subr.bf16.mxu1 %v2260_v39  ;;  %v2309_v39 = vld [vmem:[#allocation5 + $0x3a0] ss:$8 sps:$4 sm:$0xff]  }
 0x16d   :  { %868 = vmatpush1.bf16.msra.mxu1 %v2258_v40  ;;  %v2314_v40 = vld [vmem:[#allocation5 + $0x3b4] ss:$8 sps:$4 sm:$0xff]  }
 0x16e   :  { %869 = vmatprep.subr.bf16.mxu1 %v2263_v41  ;;  %v2312_v41 = vld [vmem:[#allocation5 + $0x3b0] ss:$8 sps:$4 sm:$0xff]  }
 0x171   :  { %870 = vmatpush1.bf16.msra.mxu1 %v2261_v42  ;;  %v2315_v42 = vld [vmem:[#allocation5 + $0x3c0] ss:$8 sps:$4 sm:$0xff]  }
 0x172   :  { %871 = vmatprep.subr.bf16.mxu1 %v2266_v43  ;;  %v2317_v43 = vld [vmem:[#allocation5 + $0x3c4] ss:$8 sps:$4 sm:$0xff]  }
 0x175   :  { %872 = vmatpush1.bf16.msra.mxu1 %v2264_v44  ;;  %v2320_v44 = vld [vmem:[#allocation5 + $0x3d4] ss:$8 sps:$4 sm:$0xff]  }
 0x176   :  { %873 = vmatprep.subr.bf16.mxu1 %v2269_v45  ;;  %v2318_v45 = vld [vmem:[#allocation5 + $0x3d0] ss:$8 sps:$4 sm:$0xff]  }
 0x179   :  { %874 = vmatpush1.bf16.msra.mxu1 %v2267_v46  ;;  %v2323_v46 = vld [vmem:[#allocation5 + $0x3e4] ss:$8 sps:$4 sm:$0xff]  }
 0x17a   :  { %875 = vmatprep.subr.bf16.mxu1 %v2272_v47  ;;  %v2321_v47 = vld [vmem:[#allocation5 + $0x3e0] ss:$8 sps:$4 sm:$0xff]  }
 0x17d   :  { %876 = vmatpush1.bf16.msra.mxu1 %v2270_v48  ;;  %v2326_v48 = vld [vmem:[#allocation5 + $0x3f4] ss:$8 sps:$4 sm:$0xff]  }
 0x17e   :  { %877 = vmatprep.subr.bf16.mxu1 %v2275_v62  ;;  %v722_v62 = vld [vmem:[#allocation7 + $0x6] sm:$0x3] }
 0x181   :  { %878 = vmatpush1.bf16.msra.mxu1 %v2273_v63  ;;  %v727_v63 = vrot.slane %v722_v62, %v2647_v10 }
 0x182   :  { %879 = vmatprep.subr.bf16.mxu1 %v2278_v0  ;;  %v731_v0 = vrot.slane %v722_v62, %v2649_v12  ;;  %v2390_v62 = vld [vmem:[#allocation5 + $0x550] ss:$8 sps:$4 sm:$0xff]  }
 0x185   :  { %880 = vmatpush1.bf16.msra.mxu1 %v2276_v1 }
 0x186   :  { %1275 = vmatprep.subr.bf16.mxu1 %v2317_v43 }
 0x22b   :  { %v479_v52 = vpop.f32.mrb[0].mxu1 }
 0x22c   :  { %v480_v53 = vadd.f32 %v479_v52, %v315_v50  ;;  %v481_v54 = vpop.f32.mrb[1].mxu1  ;;  %v2329_v50 = vld [vmem:[#allocation5 + $0x404] ss:$8 sps:$4 sm:$0xff]   ;;  %v2332_v52 = vld [vmem:[#allocation5 + $0x414] ss:$8 sps:$4 sm:$0xff]  }
 0x22d   :  { %v482_v55 = vadd.f32 %v481_v54, %v319_v51  ;;  %v483_v56 = vpop.f32.mrb[2].mxu1  ;;  %v2327_v51 = vld [vmem:[#allocation5 + $0x400] ss:$8 sps:$4 sm:$0xff]   ;;  %v2335_v54 = vld [vmem:[#allocation5 + $0x424] ss:$8 sps:$4 sm:$0xff]  }
 0x22e   :  { %v486_v57 = vmax.f32 %v480_v53, 0.0  ;;  %v484_v58 = vpop.f32.mrb[3].mxu1  ;;  %v2330_v53 = vld [vmem:[#allocation5 + $0x410] ss:$8 sps:$4 sm:$0xff]   ;;  %v2338_v56 = vld [vmem:[#allocation5 + $0x434] ss:$8 sps:$4 sm:$0xff]  }
 0x22f   :  { %v487_v59 = vmax.f32 %v482_v55, 0.0  ;;  %v2333_v55 = vld [vmem:[#allocation5 + $0x420] ss:$8 sps:$4 sm:$0xff]   ;;  %v2341_v58 = vld [vmem:[#allocation5 + $0x444] ss:$8 sps:$4 sm:$0xff]  }
 0x230   :  { %v488_v61 = vpack.c.bf16 %v486_v57, %v486_v57  ;;  %v2336_v57 = vld [vmem:[#allocation5 + $0x430] ss:$8 sps:$4 sm:$0xff]  }
 0x231   :  { %v489_v60 = vpack.c.bf16 %v487_v59, %v487_v59  ;;  %v2339_v59 = vld [vmem:[#allocation5 + $0x440] ss:$8 sps:$4 sm:$0xff]  }
 0x233   :  { %1983 = vmatprep.mubr.msk.bf16.mxu0 %vm235_vm0, %v489_v60  ;;  %v2344_v60 = vld [vmem:[#allocation5 + $0x454] ss:$8 sps:$4 sm:$0xff]  }
 0x234   :  { %684 = vmatmul.mubr.bf16.vlgmr.msra.gmra.mrb[4].mxu0 %v488_v61  ;;  %v2342_v61 = vld [vmem:[#allocation5 + $0x450] ss:$8 sps:$4 sm:$0xff]  }
 0x235   :  { %1070 = vmatpush1.bf16.msra.mxu0 %v2279_v2 }
 0x236   :  { %1071 = vmatprep.subr.bf16.mxu0 %v2284_v4 }
 0x239   :  { %1072 = vmatpush1.bf16.msra.mxu0 %v2282_v5 }
 0x23a   :  { %1073 = vmatprep.subr.bf16.mxu0 %v2287_v6 }
 0x23d   :  { %1074 = vmatpush1.bf16.msra.mxu0 %v2285_v7 }
 0x23e   :  { %1075 = vmatprep.subr.bf16.mxu0 %v2290_v9 }
 0x241   :  { %1076 = vmatpush1.bf16.msra.mxu0 %v2288_v11 }
 0x242   :  { %1077 = vmatprep.subr.bf16.mxu0 %v2293_v13 }
 0x245   :  { %1078 = vmatpush1.bf16.msra.mxu0 %v2291_v14 }
 0x246   :  { %1079 = vmatprep.subr.bf16.mxu0 %v2296_v15 }
 0x249   :  { %1080 = vmatpush1.bf16.msra.mxu0 %v2294_v16 }
 0x24a   :  { %1081 = vmatprep.subr.bf16.mxu0 %v2299_v17 }
 0x24d   :  { %1082 = vmatpush1.bf16.msra.mxu0 %v2297_v18  ;;  %v2347_v18 = vld [vmem:[#allocation5 + $0x464] ss:$8 sps:$4 sm:$0xff]  }
 0x24e   :  { %1083 = vmatprep.subr.bf16.mxu0 %v2302_v19  ;;  %v2345_v19 = vld [vmem:[#allocation5 + $0x460] ss:$8 sps:$4 sm:$0xff]  }
 0x251   :  { %1084 = vmatpush1.bf16.msra.mxu0 %v2300_v20  ;;  %v2350_v20 = vld [vmem:[#allocation5 + $0x474] ss:$8 sps:$4 sm:$0xff]  }
 0x252   :  { %1085 = vmatprep.subr.bf16.mxu0 %v2305_v21  ;;  %v2348_v21 = vld [vmem:[#allocation5 + $0x470] ss:$8 sps:$4 sm:$0xff]  }
 0x255   :  { %1086 = vmatpush1.bf16.msra.mxu0 %v2303_v22  ;;  %v2351_v22 = vld [vmem:[#allocation5 + $0x480] ss:$8 sps:$4 sm:$0xff]  }
 0x256   :  { %1087 = vmatprep.subr.bf16.mxu0 %v2308_v36  ;;  %v2374_v36 = vld [vmem:[#allocation5 + $0x4f4] ss:$8 sps:$4 sm:$0xff]  }
 0x259   :  { %1088 = vmatpush1.bf16.msra.mxu0 %v2306_v37  ;;  %v2372_v37 = vld [vmem:[#allocation5 + $0x4f0] ss:$8 sps:$4 sm:$0xff]  }
 0x25a   :  { %1089 = vmatprep.subr.bf16.mxu0 %v2311_v38  ;;  %v2377_v38 = vld [vmem:[#allocation5 + $0x504] ss:$8 sps:$4 sm:$0xff]  }
 0x25d   :  { %1090 = vmatpush1.bf16.msra.mxu0 %v2309_v39  ;;  %v2375_v39 = vld [vmem:[#allocation5 + $0x500] ss:$8 sps:$4 sm:$0xff]  }
 0x25e   :  { %1091 = vmatprep.subr.bf16.mxu0 %v2314_v40  ;;  %v2380_v40 = vld [vmem:[#allocation5 + $0x514] ss:$8 sps:$4 sm:$0xff]  }
 0x261   :  { %1092 = vmatpush1.bf16.msra.mxu0 %v2312_v41  ;;  %v2378_v41 = vld [vmem:[#allocation5 + $0x510] ss:$8 sps:$4 sm:$0xff]  }
 0x262   :  { %1483 = vmatprep.subr.bf16.mxu0 %v2353_v23 }
 0x307   :  { %v685_v26 = vpop.f32.mrb[4].mxu0 }
 0x308   :  { %v686_v27 = vadd.f32 %v685_v26, %v521_v24  ;;  %v687_v28 = vpop.f32.mrb[5].mxu0  ;;  %v2356_v24 = vld [vmem:[#allocation5 + $0x494] ss:$8 sps:$4 sm:$0xff]   ;;  %v2359_v26 = vld [vmem:[#allocation5 + $0x4a4] ss:$8 sps:$4 sm:$0xff]  }
 0x309   :  { %v688_v29 = vadd.f32 %v687_v28, %v525_v25  ;;  %v689_v30 = vpop.f32.mrb[6].mxu0  ;;  %v2354_v25 = vld [vmem:[#allocation5 + $0x490] ss:$8 sps:$4 sm:$0xff]   ;;  %v2362_v28 = vld [vmem:[#allocation5 + $0x4b4] ss:$8 sps:$4 sm:$0xff]  }
 0x30a   :  { %v692_v31 = vmax.f32 %v686_v27, 0.0  ;;  %v690_v32 = vpop.f32.mrb[7].mxu0  ;;  %v2357_v27 = vld [vmem:[#allocation5 + $0x4a0] ss:$8 sps:$4 sm:$0xff]   ;;  %v2365_v30 = vld [vmem:[#allocation5 + $0x4c4] ss:$8 sps:$4 sm:$0xff]  }
 0x30b   :  { %v693_v33 = vmax.f32 %v688_v29, 0.0  ;;  %v2360_v29 = vld [vmem:[#allocation5 + $0x4b0] ss:$8 sps:$4 sm:$0xff]   ;;  %v2368_v32 = vld [vmem:[#allocation5 + $0x4d4] ss:$8 sps:$4 sm:$0xff]  }
 0x30c   :  { %v694_v35 = vpack.c.bf16 %v692_v31, %v692_v31  ;;  %v2363_v31 = vld [vmem:[#allocation5 + $0x4c0] ss:$8 sps:$4 sm:$0xff]  }
 0x30d   :  { %v695_v34 = vpack.c.bf16 %v693_v33, %v693_v33  ;;  %v2366_v33 = vld [vmem:[#allocation5 + $0x4d0] ss:$8 sps:$4 sm:$0xff]  }
 0x30f   :  { %2008 = vmatprep.mubr.msk.bf16.mxu1 %vm235_vm0, %v695_v34  ;;  %v2371_v34 = vld [vmem:[#allocation5 + $0x4e4] ss:$8 sps:$4 sm:$0xff]  }
 0x310   :  { %890 = vmatmul.mubr.bf16.vlgmr.msra.gmra.mrb[4].mxu1 %v694_v35  ;;  %v2369_v35 = vld [vmem:[#allocation5 + $0x4e0] ss:$8 sps:$4 sm:$0xff]  }
 0x311   :  { %1276 = vmatpush1.bf16.msra.mxu1 %v2315_v42  ;;  %v934_v42 = vld [vmem:[#allocation7 + $0x8] sm:$0x3] }
 0x312   :  { %1277 = vmatprep.subr.bf16.mxu1 %v2320_v44  ;;  %v939_v43 = vrot.slane %v934_v42, %v2647_v10  ;;  %v943_v44 = vrot.slane %v934_v42, %v2649_v12  ;;  %v2427_v42 = vld [vmem:[#allocation8 + $0x20] sm:$0xff]  }
 0x315   :  { %1278 = vmatpush1.bf16.msra.mxu1 %v2318_v45 }
 0x316   :  { %1279 = vmatprep.subr.bf16.mxu1 %v2323_v46 }
 0x319   :  { %1280 = vmatpush1.bf16.msra.mxu1 %v2321_v47 }
 0x31a   :  { %1281 = vmatprep.subr.bf16.mxu1 %v2326_v48 }
 0x31d   :  { %1282 = vmatpush1.bf16.msra.mxu1 %v2324_v49 }
 0x31e   :  { %1283 = vmatprep.subr.bf16.mxu1 %v2329_v50 }
 0x321   :  { %1284 = vmatpush1.bf16.msra.mxu1 %v2327_v51 }
 0x322   :  { %1285 = vmatprep.subr.bf16.mxu1 %v2332_v52 }
 0x325   :  { %1286 = vmatpush1.bf16.msra.mxu1 %v2330_v53 }
 0x326   :  { %1287 = vmatprep.subr.bf16.mxu1 %v2335_v54 }
 0x329   :  { %1288 = vmatpush1.bf16.msra.mxu1 %v2333_v55  ;;  %v2383_v55 = vld [vmem:[#allocation5 + $0x524] ss:$8 sps:$4 sm:$0xff]  }
 0x32a   :  { %1289 = vmatprep.subr.bf16.mxu1 %v2338_v56  ;;  %v2381_v56 = vld [vmem:[#allocation5 + $0x520] ss:$8 sps:$4 sm:$0xff]  }
 0x32d   :  { %1290 = vmatpush1.bf16.msra.mxu1 %v2336_v57  ;;  %v2386_v57 = vld [vmem:[#allocation5 + $0x534] ss:$8 sps:$4 sm:$0xff]  }
 0x32e   :  { %1291 = vmatprep.subr.bf16.mxu1 %v2341_v58  ;;  %v2384_v58 = vld [vmem:[#allocation5 + $0x530] ss:$8 sps:$4 sm:$0xff]  }
 0x331   :  { %1292 = vmatpush1.bf16.msra.mxu1 %v2339_v59  ;;  %v2387_v59 = vld [vmem:[#allocation5 + $0x540] ss:$8 sps:$4 sm:$0xff]  }
 0x332   :  { %1293 = vmatprep.subr.bf16.mxu1 %v2344_v60  ;;  %v2389_v60 = vld [vmem:[#allocation5 + $0x544] ss:$8 sps:$4 sm:$0xff]  }
 0x335   :  { %1294 = vmatpush1.bf16.msra.mxu1 %v2342_v61  ;;  %v2392_v61 = vld [vmem:[#allocation5 + $0x554] ss:$8 sps:$4 sm:$0xff]  }
 0x336   :  { %1295 = vmatprep.subr.bf16.mxu1 %v2347_v18  ;;  %v2416_v18 = vld [vmem:[#allocation5 + $0x5d4] ss:$8 sps:$4 sm:$0xff]  }
 0x339   :  { %1296 = vmatpush1.bf16.msra.mxu1 %v2345_v19  ;;  %v2414_v19 = vld [vmem:[#allocation5 + $0x5d0] ss:$8 sps:$4 sm:$0xff]  }
 0x33a   :  { %1297 = vmatprep.subr.bf16.mxu1 %v2350_v20  ;;  %v1140_v20 = vld [vmem:[#allocation7 + $0xa] sm:$0x3] }
 0x33d   :  { %1298 = vmatpush1.bf16.msra.mxu1 %v2348_v21  ;;  %v1145_v21 = vrot.slane %v1140_v20, %v2647_v10 }
 0x33e   :  { %1689 = vmatprep.subr.bf16.mxu1 %v2389_v60 }
 0x3e3   :  { %v891_v1 = vpop.f32.mrb[4].mxu1 }
 0x3e4   :  { %v892_v2 = vadd.f32 %v891_v1, %v727_v63  ;;  %v893_v3 = vpop.f32.mrb[5].mxu1  ;;  %v2395_v63 = vld [vmem:[#allocation5 + $0x564] ss:$8 sps:$4 sm:$0xff]   ;;  %v2398_v1 = vld [vmem:[#allocation5 + $0x574] ss:$8 sps:$4 sm:$0xff]  }
 0x3e5   :  { %v894_v4 = vadd.f32 %v893_v3, %v731_v0  ;;  %v895_v5 = vpop.f32.mrb[6].mxu1  ;;  %v2393_v0 = vld [vmem:[#allocation5 + $0x560] ss:$8 sps:$4 sm:$0xff]   ;;  %v2401_v3 = vld [vmem:[#allocation5 + $0x584] ss:$8 sps:$4 sm:$0xff]  }
 0x3e6   :  { %vm898_vm1 = vcmp.gt.f32.partialorder %v892_v2, 0.0  ;;  %v900_v6 = vmul.f32 0.2, %v892_v2  ;;  %v896_v7 = vpop.f32.mrb[7].mxu1  ;;  %v2404_v5 = vld [vmem:[#allocation5 + $0x594] ss:$8 sps:$4 sm:$0xff]  }
 0x3e7   :  { %vm899_vm2 = vcmp.gt.f32.partialorder %v894_v4, 0.0  ;;  %v901_v9 = vmul.f32 0.2, %v894_v4  ;;  %v2407_v7 = vld [vmem:[#allocation5 + $0x5a4] ss:$8 sps:$4 sm:$0xff]  }
 0x3e8   :  { %v2662_v11 = vsel %vm898_vm1, %v892_v2, %v900_v6  ;;  %v2396_v2 = vld [vmem:[#allocation5 + $0x570] ss:$8 sps:$4 sm:$0xff]  }
 0x3e9   :  { %v904_v13 = vmax.f32 %v2662_v11, 0.0  ;;  %v2665_v14 = vsel %vm899_vm2, %v894_v4, %v901_v9  ;;  %v2399_v4 = vld [vmem:[#allocation5 + $0x580] ss:$8 sps:$4 sm:$0xff]   ;;  %v2402_v6 = vld [vmem:[#allocation5 + $0x590] ss:$8 sps:$4 sm:$0xff]  }
 0x3ea   :  { %v905_v15 = vmax.f32 %v2665_v14, 0.0  ;;  %v2405_v9 = vld [vmem:[#allocation5 + $0x5a0] ss:$8 sps:$4 sm:$0xff]  }
 0x3eb   :  { %v906_v17 = vpack.c.bf16 %v904_v13, %v904_v13  ;;  %v2410_v13 = vld [vmem:[#allocation5 + $0x5b4] ss:$8 sps:$4 sm:$0xff]  }
 0x3ec   :  { %v907_v16 = vpack.c.bf16 %v905_v15, %v905_v15  ;;  %v2408_v15 = vld [vmem:[#allocation5 + $0x5b0] ss:$8 sps:$4 sm:$0xff]  }
 0x3ee   :  { %2033 = vmatprep.mubr.msk.bf16.mxu0 %vm235_vm0, %v907_v16  ;;  %v2413_v16 = vld [vmem:[#allocation5 + $0x5c4] ss:$8 sps:$4 sm:$0xff]  }
 0x3ef   :  { %1102 = vmatmul.mubr.bf16.vlgmr.msra.gmra.mrb[8].mxu0 %v906_v17  ;;  %v2411_v17 = vld [vmem:[#allocation5 + $0x5c0] ss:$8 sps:$4 sm:$0xff]  }
 0x3f0   :  { %1484 = vmatpush1.bf16.msra.mxu0 %v2351_v22  ;;  %v1149_v22 = vrot.slane %v1140_v20, %v2649_v12 }
 0x3f1   :  { %1485 = vmatprep.subr.bf16.mxu0 %v2356_v24 }
 0x3f4   :  { %1486 = vmatpush1.bf16.msra.mxu0 %v2354_v25 }
 0x3f5   :  { %1487 = vmatprep.subr.bf16.mxu0 %v2359_v26 }
 0x3f8   :  { %1488 = vmatpush1.bf16.msra.mxu0 %v2357_v27 }
 0x3f9   :  { %1489 = vmatprep.subr.bf16.mxu0 %v2362_v28 }
 0x3fc   :  { %1490 = vmatpush1.bf16.msra.mxu0 %v2360_v29 }
 0x3fd   :  { %1491 = vmatprep.subr.bf16.mxu0 %v2365_v30 }
 0x400   :  { %1492 = vmatpush1.bf16.msra.mxu0 %v2363_v31 }
 0x401   :  { %1493 = vmatprep.subr.bf16.mxu0 %v2368_v32 }
 0x404   :  { %1494 = vmatpush1.bf16.msra.mxu0 %v2366_v33 }
 0x405   :  { %1495 = vmatprep.subr.bf16.mxu0 %v2371_v34 }
 0x408   :  { %1496 = vmatpush1.bf16.msra.mxu0 %v2369_v35  ;;  %v2419_v35 = vld [vmem:[#allocation5 + $0x5e4] ss:$8 sps:$4 sm:$0xff]  }
 0x409   :  { %1497 = vmatprep.subr.bf16.mxu0 %v2374_v36  ;;  %v2417_v36 = vld [vmem:[#allocation5 + $0x5e0] ss:$8 sps:$4 sm:$0xff]  }
 0x40c   :  { %1498 = vmatpush1.bf16.msra.mxu0 %v2372_v37  ;;  %v2422_v37 = vld [vmem:[#allocation5 + $0x5f4] ss:$8 sps:$4 sm:$0xff]  }
 0x40d   :  { %1499 = vmatprep.subr.bf16.mxu0 %v2377_v38  ;;  %v2423_v38 = vld [vmem:[#allocation8] sm:$0xff]  }
 0x410   :  { %1500 = vmatpush1.bf16.msra.mxu0 %v2375_v39  ;;  %v2424_v39 = vld [vmem:[#allocation8 + $0x8] sm:$0xff]  }
 0x411   :  { %1501 = vmatprep.subr.bf16.mxu0 %v2380_v40  ;;  %v2425_v40 = vld [vmem:[#allocation8 + $0x10] sm:$0xff]  }
 0x414   :  { %1502 = vmatpush1.bf16.msra.mxu0 %v2378_v41  ;;  %v2426_v41 = vld [vmem:[#allocation8 + $0x18] sm:$0xff]  }
 0x415   :  { %1503 = vmatprep.subr.bf16.mxu0 %v2383_v55 }
 0x418   :  { %1504 = vmatpush1.bf16.msra.mxu0 %v2381_v56 }
 0x419   :  { %1505 = vmatprep.subr.bf16.mxu0 %v2386_v57 }
 0x41c   :  { %1506 = vmatpush1.bf16.msra.mxu0 %v2384_v58 }
 0x4c2   :  { %v1103_v45 = vpop.f32.mrb[8].mxu0 }
 0x4c3   :  { %v1104_v46 = vadd.f32 %v1103_v45, %v939_v43  ;;  %v1105_v47 = vpop.f32.mrb[9].mxu0  ;;  %v2428_v43 = vld [vmem:[#allocation8 + $0x28] sm:$0xff]   ;;  %v2430_v45 = vld [vmem:[#allocation8 + $0x38] sm:$0xff]  }
 0x4c4   :  { %v1106_v48 = vadd.f32 %v1105_v47, %v943_v44  ;;  %v1107_v49 = vpop.f32.mrb[10].mxu0  ;;  %v2429_v44 = vld [vmem:[#allocation8 + $0x30] sm:$0xff]   ;;  %v2432_v47 = vld [vmem:[#allocation8 + $0x48] sm:$0xff]  }
 0x4c5   :  { %v1110_v50 = vmax.f32 %v1104_v46, 0.0  ;;  %v1108_v51 = vpop.f32.mrb[11].mxu0  ;;  %v2431_v46 = vld [vmem:[#allocation8 + $0x40] sm:$0xff]  }
 0x4c6   :  { %v1111_v52 = vmax.f32 %v1106_v48, 0.0  ;;  %v1348_v48 = vld [vmem:[#allocation7 + $0xc] sm:$0x3] }
 0x4c7   :  { %v1112_v54 = vpack.c.bf16 %v1110_v50, %v1110_v50  ;;  %v1353_v49 = vrot.slane %v1348_v48, %v2647_v10  ;;  %v1357_v50 = vrot.slane %v1348_v48, %v2649_v12 }
 0x4c8   :  { %v1113_v53 = vpack.c.bf16 %v1111_v52, %v1111_v52 }
 0x4ca   :  { %2058 = vmatprep.mubr.msk.bf16.mxu1 %vm235_vm0, %v1113_v53 }
 0x4cb   :  { %1308 = vmatmul.mubr.bf16.vlgmr.msra.gmra.mrb[8].mxu1 %v1112_v54 }
 0x4cc   :  { %1690 = vmatpush1.bf16.msra.mxu1 %v2387_v59 }
 0x4cd   :  { %1691 = vmatprep.subr.bf16.mxu1 %v2392_v61  ;;  %v2433_v61 = vld [vmem:[#allocation8 + $0x50] sm:$0xff]  }
 0x4d0   :  { %1692 = vmatpush1.bf16.msra.mxu1 %v2390_v62  ;;  %v2434_v62 = vld [vmem:[#allocation8 + $0x58] sm:$0xff]  }
 0x4d1   :  { %1693 = vmatprep.subr.bf16.mxu1 %v2395_v63  ;;  %v1554_v63 = vld [vmem:[#allocation7 + $0xe] sm:$0x3] }
 0x4d4   :  { %1694 = vmatpush1.bf16.msra.mxu1 %v2393_v0  ;;  %v1559_v0 = vrot.slane %v1554_v63, %v2647_v10  ;;  %v2109_v10 = vld [vmem:[%s2711_s4] ss:$0 sm:$0xff]  ;;  %s2525_s4 = scalar_lea.vmem %s1899_s20, 128 }
 0x4d5   :  { %1695 = vmatprep.subr.bf16.mxu1 %v2398_v1  ;;  %v1563_v1 = vrot.slane %v1554_v63, %v2649_v12  ;;  %v1881_v12 = vand.u32 127, %v105_v8  ;;  %p2526_p4 = scmp.ne.s32.totalorder %s1899_s20, %s2525_s4  ;;  %p2531_p6 = scmp.lt.s32.totalorder %s2525_s4, %s2525_s4 }
 0x4d7   :  { %vm1882_vm3 = vcmp.lt.s32.totalorder %v1881_v12, 4  ;;  %p2532_p7 = por %p2531_p6, %p2530_p5 }
 0x4d8   :  { %1696 = vmatpush1.bf16.msra.mxu1 %v2396_v2 }
 0x4d9   :  { %1697 = vmatprep.subr.bf16.mxu1 %v2401_v3  ;;  %p2533_p8 = pnand %p2532_p7, %p2526_p4 }
 0x4dc   :  { %1698 = vmatpush1.bf16.msra.mxu1 %v2399_v4 }
 0x4dd   :  { %1699 = vmatprep.subr.bf16.mxu1 %v2404_v5 }
 0x4e0   :  { %1700 = vmatpush1.bf16.msra.mxu1 %v2402_v6 }
 0x4e1   :  { %1701 = vmatprep.subr.bf16.mxu1 %v2407_v7 }
 0x4e4   :  { %1702 = vmatpush1.bf16.msra.mxu1 %v2405_v9 }
 0x4e5   :  { %1703 = vmatprep.subr.bf16.mxu1 %v2410_v13 }
 0x4e8   :  { %1704 = vmatpush1.bf16.msra.mxu1 %v2408_v15 }
 0x4e9   :  { %1705 = vmatprep.subr.bf16.mxu1 %v2413_v16 }
 0x4ec   :  { %1706 = vmatpush1.bf16.msra.mxu1 %v2411_v17 }
 0x4ed   :  { %1707 = vmatprep.subr.bf16.mxu1 %v2416_v18 }
 0x4f0   :  { %1708 = vmatpush1.bf16.msra.mxu1 %v2414_v19 }
 0x4f1   :  { %1709 = vmatprep.subr.bf16.mxu1 %v2419_v35 }
 0x4f4   :  { %1710 = vmatpush1.bf16.msra.mxu1 %v2417_v36 }
 0x4f5   :  { %1711 = vmatprep.subr.bf16.mxu1 %v2422_v37 }
 0x59e   :  { %v1309_v23 = vpop.f32.mrb[8].mxu1 }
 0x59f   :  { %v1310_v24 = vadd.f32 %v1309_v23, %v1145_v21  ;;  %v1311_v25 = vpop.f32.mrb[9].mxu1 }
 0x5a0   :  { %v1312_v26 = vadd.f32 %v1311_v25, %v1149_v22  ;;  %v1313_v27 = vpop.f32.mrb[10].mxu1 }
 0x5a1   :  { %v2675_v28 = vadd.f32 %v1310_v24, %v2662_v11  ;;  %v1314_v29 = vpop.f32.mrb[11].mxu1  ;;  %v2420_v11 = vld [vmem:[#allocation5 + $0x5f0] ss:$8 sps:$4 sm:$0xff]  }
 0x5a2   :  { %v2678_v30 = vadd.f32 %v1312_v26, %v2665_v14  ;;  %1712 = vmatpush1.bf16.msra.mxu1 %v2420_v11  ;;  %v2565_v14 = vmov 0  }
 0x5a3   :  { %v1318_v31 = vmax.f32 %v2675_v28, 0.0  ;;  %1840 = vmatprep.subr.bf16.mxu0 %v2565_v14 }
 0x5a4   :  { %v1319_v32 = vmax.f32 %v2678_v30, 0.0 }
 0x5a5   :  { %v1320_v34 = vpack.c.bf16 %v1318_v31, %v1318_v31 }
 0x5a6   :  { %v1321_v33 = vpack.c.bf16 %v1319_v32, %v1319_v32 }
 0x5a8   :  { %2083 = vmatprep.mubr.msk.bf16.mxu0 %vm235_vm0, %v1321_v33 }
 0x5a9   :  { %1516 = vmatmul.mubr.bf16.vlgmr.msra.gmra.mrb[12].mxu0 %v1320_v34 }
 0x5aa   :  { %1841 = vmatpush1.bf16.msra.mxu0 %v2423_v38 }
 0x5ab   :  { %1842 = vmatprep.subr.bf16.mxu0 %v2565_v14 }
 0x5ae   :  { %1843 = vmatpush1.bf16.msra.mxu0 %v2424_v39 }
 0x5af   :  { %1844 = vmatprep.subr.bf16.mxu0 %v2565_v14 }
 0x5b2   :  { %1845 = vmatpush1.bf16.msra.mxu0 %v2425_v40 }
 0x5b3   :  { %1846 = vmatprep.subr.bf16.mxu0 %v2565_v14 }
 0x5b6   :  { %1847 = vmatpush1.bf16.msra.mxu0 %v2426_v41 }
 0x5b7   :  { %1848 = vmatprep.subr.bf16.mxu0 %v2565_v14 }
 0x5ba   :  { %1849 = vmatpush1.bf16.msra.mxu0 %v2427_v42 }
 0x5bb   :  { %1850 = vmatprep.subr.bf16.mxu0 %v2565_v14 }
 0x5be   :  { %1851 = vmatpush1.bf16.msra.mxu0 %v2428_v43 }
 0x5bf   :  { %1852 = vmatprep.subr.bf16.mxu0 %v2565_v14 }
 0x5c2   :  { %1853 = vmatpush1.bf16.msra.mxu0 %v2429_v44 }
 0x5c3   :  { %1854 = vmatprep.subr.bf16.mxu0 %v2565_v14 }
 0x5c6   :  { %1855 = vmatpush1.bf16.msra.mxu0 %v2430_v45 }
 0x5c7   :  { %1856 = vmatprep.subr.bf16.mxu0 %v2565_v14 }
 0x5ca   :  { %1857 = vmatpush1.bf16.msra.mxu0 %v2431_v46 }
 0x5cb   :  { %1858 = vmatprep.subr.bf16.mxu0 %v2565_v14 }
 0x5ce   :  { %1859 = vmatpush1.bf16.msra.mxu0 %v2432_v47 }
 0x5cf   :  { %1860 = vmatprep.subr.bf16.mxu0 %v2565_v14 }
 0x5d2   :  { %1861 = vmatpush1.bf16.msra.mxu0 %v2433_v61 }
 0x5d3   :  { %1862 = vmatprep.subr.bf16.mxu0 %v2565_v14 }
 0x5d6   :  { %1863 = vmatpush1.bf16.msra.mxu0 %v2434_v62 }
 0x67c   :  { %v1517_v51 = vpop.f32.mrb[12].mxu0 }
 0x67d   :  { %v1518_v52 = vadd.f32 %v1517_v51, %v1353_v49  ;;  %v1519_v53 = vpop.f32.mrb[13].mxu0 }
 0x67e   :  { %v1520_v54 = vadd.f32 %v1519_v53, %v1357_v50  ;;  %v1521_v55 = vpop.f32.mrb[14].mxu0 }
 0x67f   :  { %v1524_v56 = vmax.f32 %v1518_v52, 0.0  ;;  %v1522_v57 = vpop.f32.mrb[15].mxu0 }
 0x680   :  { %v1525_v58 = vmax.f32 %v1520_v54, 0.0 }
 0x681   :  { %v1526_v60 = vpack.c.bf16 %v1524_v56, %v1524_v56 }
 0x682   :  { %v1527_v59 = vpack.c.bf16 %v1525_v58, %v1525_v58 }
 0x684   :  { %2108 = vmatprep.mubr.msk.bf16.mxu1 %vm235_vm0, %v1527_v59 }
 0x685   :  { %1722 = vmatmul.mubr.bf16.vlgmr.msra.gmra.mrb[12].mxu1 %v1526_v60 }
 0x758   :  { %v1723_v2 = vpop.f32.mrb[12].mxu1 }
 0x759   :  { %v1724_v3 = vadd.f32 %v1723_v2, %v1559_v0  ;;  %v1725_v4 = vpop.f32.mrb[13].mxu1 }
 0x75a   :  { %v1726_v5 = vadd.f32 %v1725_v4, %v1563_v1  ;;  %v1727_v6 = vpop.f32.mrb[14].mxu1 }
 0x75b   :  { %v1730_v7 = vadd.f32 %v1724_v3, %v2675_v28  ;;  %v1728_v9 = vpop.f32.mrb[15].mxu1 }
 0x75c   :  { %v1731_v13 = vadd.f32 %v1726_v5, %v2678_v30 }
 0x75d   :  { %v1732_v16 = vpack.c.bf16 %v1730_v7, %v1730_v7 }
 0x75e   :  { %v1733_v15 = vpack.c.bf16 %v1731_v13, %v1731_v13 }
 0x760   :  { %2122 = vmatprep.mubr.msk.bf16.mxu0 %vm235_vm0, %v1733_v15 }
 0x761   :  { %1873 = vmatmul.mubr.bf16.vlgmr.msra.gmra.mrb[16].mxu0 %v1732_v16 }
 0x834   :  { %v1874_v17 = vpop.f32.mrb[16].mxu0 }
 0x835   :  { %v1875_v18 = vadd.f32 %v2109_v10, %v1874_v17  ;;  %v1876_v19 = vpop.f32.mrb[17].mxu0 }
 0x836   :  { %v1877_v20 = vpop.f32.mrb[18].mxu0 }
 0x837   :  { %v1878_v21 = vpop.f32.mrb[19].mxu0  ;;  %v1883_v22 = vmul.f32 %v1875_v18, %v1875_v18 }
 0x839   :  { %v1884_v23 = vsel %vm1882_vm3, %v1883_v22, 0.0 }
 0x83a   :  { %1885 = vadd.xlane.f32.xlu0 %v1884_v23 }
 0x8c7   :  { %v1886_v24 = vpop.xlane.xlu0 %1885 }
 0x8c8   :  { %v1887_v25 = vmax.f32 %v1886_v24, 1e-24 }
 0x8ca   :  { %2435 = vrsqrt.f32 %v1887_v25 }
 0x8d4   :  { %v2436_v26 = vpop.eup %2435 }
 0x8d5   :  { %v1889_v27 = vmul.f32 %v2436_v26, %v1875_v18 }
 0x8d7   :  { %v1890_v28 = vsel %vm1882_vm3, %v1889_v27, %v1875_v18 }
 0x8d8   :  { %1891 = vst [vmem:[#allocation10] sm:$0xff] %v1890_v28 }
 0x8d9   :  { %2536 = shalt.err (!%p2533_p8)
}
 0x8da   :  { %s2537_s23 = scalar_lea.hbm %s2712_s5, 128 }
 0x8db   :  { %p2538_p9 = scmp.ne.s32.totalorder %s2712_s5, %s2537_s23  ;;  %p2541_p10 = scmp.lt.u32.totalorder %s2537_s23, %s2712_s5 }
 0x8dd   :  { %p2543_p11 = pnand %p2541_p10, %p2538_p9 }
 0x8df   :  { %2546 = shalt.err (!%p2543_p11)
}
 0x8e0   :  { %1901 = dma.vmem_to_hbm [thread:$0]  %s1899_s20, 128, %s2712_s5, [#allocation4]  }
 0x8e1   :  { %2553 = dma.done.wait [#allocation4], 128  }
 0x8e2   :  { %2554 = vsyncadd [#allocation4], 4294967168 }
 0x8e3   :  { %1905 = vsyncpa [#allocation3], 1 }
 0x8e4   :  { %1906 = vsyncpa [#allocation6], 1 }
 0x8e5   :  { %1907 = vsyncpa [#allocation9], 1 }
 0x8e6   :  { %1908 = vsyncpa [#allocation4], 1 }

</bundles_post_ra>
